<compile_context>
chip_gen: v6e
topology: v6e:2x2x1
jax: 0.10.0
libtpu: 0.0.40
codegen_flags: <defaults>
</compile_context>

<pallas_src>
import jax
import jax.numpy as jnp
from jax.experimental import pallas as pl
from jax.experimental.pallas import tpu as pltpu

Z_DIM = 64
IMG_DIM = 28 * 28 * 1      # 784
IMG_DIM_PAD = 896          # 7 * 128 -> lane-dense final matmul + output store
HIDDEN = (256, 512, 512, 256)
LEAKY_SLOPE = 0.01


def _round_up(n, m):
    return ((n + m - 1) // m) * m


def _leaky_relu(x, slope=LEAKY_SLOPE):
    # For 0 < slope < 1, max(x, slope*x) == leaky_relu(x); one VALU op.
    return jnp.maximum(x, slope * x)


def generator_kernel(x_ref,
                     w1_ref, b1_ref,
                     w2_ref, b2_ref,
                     w3_ref, b3_ref,
                     w4_ref, b4_ref,
                     w5_ref, b5_ref,
                     o_ref):
    def dense(h, w_ref, b_ref):
        # bf16 activations x bf16 weights on the MXU, f32 accumulation.
        return jnp.dot(h.astype(jnp.bfloat16), w_ref[...],
                       preferred_element_type=jnp.float32) + b_ref[...]

    h = x_ref[...]
    h = _leaky_relu(dense(h, w1_ref, b1_ref))
    h = _leaky_relu(dense(h, w2_ref, b2_ref))
    h = _leaky_relu(dense(h, w3_ref, b3_ref))
    h = _leaky_relu(dense(h, w4_ref, b4_ref))
    h = dense(h, w5_ref, b5_ref)
    o_ref[...] = jnp.tanh(h).astype(o_ref.dtype)


def init_params(key, z_dim=Z_DIM, img_dim_pad=IMG_DIM_PAD, img_dim=IMG_DIM,
                hidden=HIDDEN):
    """PyTorch nn.Linear-style uniform init. Weights stored bf16, biases f32.

    The final layer is padded out to img_dim_pad columns (extra columns are
    zero and are sliced away after the kernel).
    """
    dims = (z_dim,) + tuple(hidden) + (img_dim,)
    params = []
    for i in range(len(dims) - 1):
        fan_in, fan_out = dims[i], dims[i + 1]
        key, kw, kb = jax.random.split(key, 3)
        bound = 1.0 / (fan_in ** 0.5)
        w = jax.random.uniform(kw, (fan_in, fan_out), jnp.float32, -bound, bound)
        b = jax.random.uniform(kb, (1, fan_out), jnp.float32, -bound, bound)
        if i == len(dims) - 2 and fan_out != img_dim_pad:
            # Pad final layer to a lane-dense width; padded columns are zero.
            w = jnp.pad(w, ((0, 0), (0, img_dim_pad - fan_out)))
            b = jnp.pad(b, ((0, 0), (0, img_dim_pad - fan_out)))
        params.append((w.astype(jnp.bfloat16), b))
    return params


def generator_forward(x, params, *, tm=128):
    batch = x.shape[0]
    # Batch tile: at most `tm`, at least a sublane-aligned (multiple of 8) tile.
    tm = min(tm, _round_up(batch, 8))
    batch_pad = _round_up(batch, tm)
    if batch_pad != batch:
        x = jnp.pad(x, ((0, batch_pad - batch), (0, 0)))

    flat_params = [p for wb in params for p in wb]

    grid = (batch_pad // tm,)

    x_spec = pl.BlockSpec((tm, Z_DIM), lambda i: (i, 0))
    out_spec = pl.BlockSpec((tm, IMG_DIM_PAD), lambda i: (i, 0))
    # Weights/biases: full block, constant index -> VMEM-resident across grid.
    param_specs = []
    for w, b in params:
        param_specs.append(pl.BlockSpec(w.shape, lambda i: (0, 0)))
        param_specs.append(pl.BlockSpec(b.shape, lambda i: (0, 0)))

    dims = (Z_DIM,) + tuple(HIDDEN) + (IMG_DIM_PAD,)
    layer_flops = sum(dims[i] * dims[i + 1] for i in range(len(dims) - 1))
    flops = 2 * batch_pad * layer_flops
    transcendentals = batch_pad * IMG_DIM_PAD  # tanh
    weight_bytes = sum(w.size * w.dtype.itemsize + b.size * b.dtype.itemsize
                       for w, b in params)
    act_bytes = (batch_pad * Z_DIM + batch_pad * IMG_DIM_PAD) * 4
    cost = pl.CostEstimate(flops=flops,
                           transcendentals=transcendentals,
                           bytes_accessed=weight_bytes + act_bytes)

    out = pl.pallas_call(
        generator_kernel,
        out_shape=jax.ShapeDtypeStruct((batch_pad, IMG_DIM_PAD), jnp.float32),
        grid=grid,
        in_specs=[x_spec] + param_specs,
        out_specs=out_spec,
        compiler_params=pltpu.CompilerParams(
            dimension_semantics=("parallel",)),
        cost_estimate=cost,
    )(x, *flat_params)

    return out[:batch, :IMG_DIM]


def generator_reference(x, params):
    """Pure-JAX reference mirroring the kernel's bf16-weight / f32-accum math."""
    h = x
    n = len(params)
    for i, (w, b) in enumerate(params):
        h = jnp.dot(h.astype(jnp.bfloat16), w,
                    preferred_element_type=jnp.float32) + b
        if i < n - 1:
            h = jnp.maximum(h, LEAKY_SLOPE * h)
        else:
            h = jnp.tanh(h)
    return h[:, :IMG_DIM]


if __name__ == "__main__":
    key = jax.random.PRNGKey(0)
    key_params, key_x = jax.random.split(key)

    params = init_params(key_params)

    batch = 8
    x = jax.random.normal(key_x, (batch, Z_DIM), dtype=jnp.float32)

    out = generator_forward(x, params)
    out = jax.block_until_ready(out)

    ref = generator_reference(x, params)
    assert out.shape == (batch, IMG_DIM), out.shape
    # bf16 matmul path -> loosened tolerance vs the f32-exact check.
    assert jnp.allclose(out, ref, atol=1e-2, rtol=1e-2), "mismatch vs reference"
    assert bool(jnp.all(jnp.isfinite(out))), "non-finite output"

    print("KERNEL_OK")
</pallas_src>

<mosaic_0001>
module attributes {stable_mosaic.version = 11 : i64} {
  func.func @generator_kernel(%arg0: i32, %arg1: memref<8x64xf32, #tpu.memory_space<vmem>>, %arg2: memref<64x256xbf16, #tpu.memory_space<vmem>>, %arg3: memref<1x256xf32, #tpu.memory_space<vmem>>, %arg4: memref<256x512xbf16, #tpu.memory_space<vmem>>, %arg5: memref<1x512xf32, #tpu.memory_space<vmem>>, %arg6: memref<512x512xbf16, #tpu.memory_space<vmem>>, %arg7: memref<1x512xf32, #tpu.memory_space<vmem>>, %arg8: memref<512x256xbf16, #tpu.memory_space<vmem>>, %arg9: memref<1x256xf32, #tpu.memory_space<vmem>>, %arg10: memref<256x896xbf16, #tpu.memory_space<vmem>>, %arg11: memref<1x896xf32, #tpu.memory_space<vmem>>, %arg12: memref<8x896xf32, #tpu.memory_space<vmem>>) attributes {dimension_semantics = [#tpu.dimension_semantics<parallel>], iteration_bounds = array<i64: 1>, scalar_prefetch = 0 : i64, scratch_operands = 0 : i64, tpu.core_type = #tpu.core_type<tc>, window_params = [{transform_indices = @transform_0, window_bounds = array<i64: 8, 64>}, {pipeline_mode = #tpu.pipeline_mode<synchronous>, transform_indices = @transform_1, window_bounds = array<i64: 64, 256>}, {pipeline_mode = #tpu.pipeline_mode<synchronous>, transform_indices = @transform_2, window_bounds = array<i64: 1, 256>}, {pipeline_mode = #tpu.pipeline_mode<synchronous>, transform_indices = @transform_3, window_bounds = array<i64: 256, 512>}, {pipeline_mode = #tpu.pipeline_mode<synchronous>, transform_indices = @transform_4, window_bounds = array<i64: 1, 512>}, {pipeline_mode = #tpu.pipeline_mode<synchronous>, transform_indices = @transform_5, window_bounds = array<i64: 512, 512>}, {pipeline_mode = #tpu.pipeline_mode<synchronous>, transform_indices = @transform_6, window_bounds = array<i64: 1, 512>}, {pipeline_mode = #tpu.pipeline_mode<synchronous>, transform_indices = @transform_7, window_bounds = array<i64: 512, 256>}, {pipeline_mode = #tpu.pipeline_mode<synchronous>, transform_indices = @transform_8, window_bounds = array<i64: 1, 256>}, {pipeline_mode = #tpu.pipeline_mode<synchronous>, transform_indices = @transform_9, window_bounds = array<i64: 256, 896>}, {pipeline_mode = #tpu.pipeline_mode<synchronous>, transform_indices = @transform_10, window_bounds = array<i64: 1, 896>}, {transform_indices = @transform_11, window_bounds = array<i64: 8, 896>}]} {
    %c0 = arith.constant 0 : index
    %c0_0 = arith.constant 0 : index
    %0 = vector.load %arg1[%c0, %c0_0] : memref<8x64xf32, #tpu.memory_space<vmem>>, vector<8x64xf32>
    %1 = arith.truncf %0 : vector<8x64xf32> to vector<8x64xbf16>
    %c0_1 = arith.constant 0 : index
    %c0_2 = arith.constant 0 : index
    %2 = vector.load %arg2[%c0_1, %c0_2] : memref<64x256xbf16, #tpu.memory_space<vmem>>, vector<64x256xbf16>
    %cst = arith.constant dense<0.000000e+00> : vector<8x256xf32>
    %3 = tpu.matmul %1, %2, %cst {dimension_numbers = #tpu.dot_dimension_numbers<[1], [0], [0], [1], [0, 0, 1, 1], [], []>} : vector<8x64xbf16>, vector<64x256xbf16>, vector<8x256xf32> -> vector<8x256xf32>
    %c0_3 = arith.constant 0 : index
    %c0_4 = arith.constant 0 : index
    %4 = vector.load %arg3[%c0_3, %c0_4] : memref<1x256xf32, #tpu.memory_space<vmem>>, vector<1x256xf32>
    %5 = vector.broadcast %4 : vector<1x256xf32> to vector<8x256xf32>
    %6 = arith.addf %3, %5 : vector<8x256xf32>
    %cst_5 = arith.constant 0.00999999977 : f32
    %7 = vector.broadcast %cst_5 : f32 to vector<8x256xf32>
    %8 = arith.mulf %7, %6 : vector<8x256xf32>
    %9 = arith.maximumf %6, %8 : vector<8x256xf32>
    %10 = arith.truncf %9 : vector<8x256xf32> to vector<8x256xbf16>
    %c0_6 = arith.constant 0 : index
    %c0_7 = arith.constant 0 : index
    %11 = vector.load %arg4[%c0_6, %c0_7] : memref<256x512xbf16, #tpu.memory_space<vmem>>, vector<256x512xbf16>
    %cst_8 = arith.constant dense<0.000000e+00> : vector<8x512xf32>
    %12 = tpu.matmul %10, %11, %cst_8 {dimension_numbers = #tpu.dot_dimension_numbers<[1], [0], [0], [1], [0, 0, 1, 1], [], []>} : vector<8x256xbf16>, vector<256x512xbf16>, vector<8x512xf32> -> vector<8x512xf32>
    %c0_9 = arith.constant 0 : index
    %c0_10 = arith.constant 0 : index
    %13 = vector.load %arg5[%c0_9, %c0_10] : memref<1x512xf32, #tpu.memory_space<vmem>>, vector<1x512xf32>
    %14 = vector.broadcast %13 : vector<1x512xf32> to vector<8x512xf32>
    %15 = arith.addf %12, %14 : vector<8x512xf32>
    %cst_11 = arith.constant 0.00999999977 : f32
    %16 = vector.broadcast %cst_11 : f32 to vector<8x512xf32>
    %17 = arith.mulf %16, %15 : vector<8x512xf32>
    %18 = arith.maximumf %15, %17 : vector<8x512xf32>
    %19 = arith.truncf %18 : vector<8x512xf32> to vector<8x512xbf16>
    %c0_12 = arith.constant 0 : index
    %c0_13 = arith.constant 0 : index
    %20 = vector.load %arg6[%c0_12, %c0_13] : memref<512x512xbf16, #tpu.memory_space<vmem>>, vector<512x512xbf16>
    %cst_14 = arith.constant dense<0.000000e+00> : vector<8x512xf32>
    %21 = tpu.matmul %19, %20, %cst_14 {dimension_numbers = #tpu.dot_dimension_numbers<[1], [0], [0], [1], [0, 0, 1, 1], [], []>} : vector<8x512xbf16>, vector<512x512xbf16>, vector<8x512xf32> -> vector<8x512xf32>
    %c0_15 = arith.constant 0 : index
    %c0_16 = arith.constant 0 : index
    %22 = vector.load %arg7[%c0_15, %c0_16] : memref<1x512xf32, #tpu.memory_space<vmem>>, vector<1x512xf32>
    %23 = vector.broadcast %22 : vector<1x512xf32> to vector<8x512xf32>
    %24 = arith.addf %21, %23 : vector<8x512xf32>
    %cst_17 = arith.constant 0.00999999977 : f32
    %25 = vector.broadcast %cst_17 : f32 to vector<8x512xf32>
    %26 = arith.mulf %25, %24 : vector<8x512xf32>
    %27 = arith.maximumf %24, %26 : vector<8x512xf32>
    %28 = arith.truncf %27 : vector<8x512xf32> to vector<8x512xbf16>
    %c0_18 = arith.constant 0 : index
    %c0_19 = arith.constant 0 : index
    %29 = vector.load %arg8[%c0_18, %c0_19] : memref<512x256xbf16, #tpu.memory_space<vmem>>, vector<512x256xbf16>
    %cst_20 = arith.constant dense<0.000000e+00> : vector<8x256xf32>
    %30 = tpu.matmul %28, %29, %cst_20 {dimension_numbers = #tpu.dot_dimension_numbers<[1], [0], [0], [1], [0, 0, 1, 1], [], []>} : vector<8x512xbf16>, vector<512x256xbf16>, vector<8x256xf32> -> vector<8x256xf32>
    %c0_21 = arith.constant 0 : index
    %c0_22 = arith.constant 0 : index
    %31 = vector.load %arg9[%c0_21, %c0_22] : memref<1x256xf32, #tpu.memory_space<vmem>>, vector<1x256xf32>
    %32 = vector.broadcast %31 : vector<1x256xf32> to vector<8x256xf32>
    %33 = arith.addf %30, %32 : vector<8x256xf32>
    %cst_23 = arith.constant 0.00999999977 : f32
    %34 = vector.broadcast %cst_23 : f32 to vector<8x256xf32>
    %35 = arith.mulf %34, %33 : vector<8x256xf32>
    %36 = arith.maximumf %33, %35 : vector<8x256xf32>
    %37 = arith.truncf %36 : vector<8x256xf32> to vector<8x256xbf16>
    %c0_24 = arith.constant 0 : index
    %c0_25 = arith.constant 0 : index
    %38 = vector.load %arg10[%c0_24, %c0_25] : memref<256x896xbf16, #tpu.memory_space<vmem>>, vector<256x896xbf16>
    %cst_26 = arith.constant dense<0.000000e+00> : vector<8x896xf32>
    %39 = tpu.matmul %37, %38, %cst_26 {dimension_numbers = #tpu.dot_dimension_numbers<[1], [0], [0], [1], [0, 0, 1, 1], [], []>} : vector<8x256xbf16>, vector<256x896xbf16>, vector<8x896xf32> -> vector<8x896xf32>
    %c0_27 = arith.constant 0 : index
    %c0_28 = arith.constant 0 : index
    %40 = vector.load %arg11[%c0_27, %c0_28] : memref<1x896xf32, #tpu.memory_space<vmem>>, vector<1x896xf32>
    %41 = vector.broadcast %40 : vector<1x896xf32> to vector<8x896xf32>
    %42 = arith.addf %39, %41 : vector<8x896xf32>
    %43 = math.tanh %42 : vector<8x896xf32>
    %c0_29 = arith.constant 0 : index
    %c0_30 = arith.constant 0 : index
    %44 = vector.load %arg12[%c0_29, %c0_30] : memref<8x896xf32, #tpu.memory_space<vmem>>, vector<8x896xf32>
    tpu.vector_store %arg12[%c0_29, %c0_30], %43 {strides = array<i32>} : memref<8x896xf32, #tpu.memory_space<vmem>>, vector<8x896xf32>,
    return
  }
  func.func @transform_0(%arg0: i32) -> (i32, i32) {
    %c0_i32 = arith.constant 0 : i32
    %c0_i32_0 = arith.constant 0 : i32
    return %arg0, %c0_i32 : i32, i32
  }
  func.func @transform_1(%arg0: i32) -> (i32, i32) {
    %c0_i32 = arith.constant 0 : i32
    %c0_i32_0 = arith.constant 0 : i32
    %c0_i32_1 = arith.constant 0 : i32
    return %c0_i32, %c0_i32_0 : i32, i32
  }
  func.func @transform_2(%arg0: i32) -> (i32, i32) {
    %c0_i32 = arith.constant 0 : i32
    %c0_i32_0 = arith.constant 0 : i32
    %c0_i32_1 = arith.constant 0 : i32
    return %c0_i32, %c0_i32_0 : i32, i32
  }
  func.func @transform_3(%arg0: i32) -> (i32, i32) {
    %c0_i32 = arith.constant 0 : i32
    %c0_i32_0 = arith.constant 0 : i32
    %c0_i32_1 = arith.constant 0 : i32
    return %c0_i32, %c0_i32_0 : i32, i32
  }
  func.func @transform_4(%arg0: i32) -> (i32, i32) {
    %c0_i32 = arith.constant 0 : i32
    %c0_i32_0 = arith.constant 0 : i32
    %c0_i32_1 = arith.constant 0 : i32
    return %c0_i32, %c0_i32_0 : i32, i32
  }
  func.func @transform_5(%arg0: i32) -> (i32, i32) {
    %c0_i32 = arith.constant 0 : i32
    %c0_i32_0 = arith.constant 0 : i32
    %c0_i32_1 = arith.constant 0 : i32
    return %c0_i32, %c0_i32_0 : i32, i32
  }
  func.func @transform_6(%arg0: i32) -> (i32, i32) {
    %c0_i32 = arith.constant 0 : i32
    %c0_i32_0 = arith.constant 0 : i32
    %c0_i32_1 = arith.constant 0 : i32
    return %c0_i32, %c0_i32_0 : i32, i32
  }
  func.func @transform_7(%arg0: i32) -> (i32, i32) {
    %c0_i32 = arith.constant 0 : i32
    %c0_i32_0 = arith.constant 0 : i32
    %c0_i32_1 = arith.constant 0 : i32
    return %c0_i32, %c0_i32_0 : i32, i32
  }
  func.func @transform_8(%arg0: i32) -> (i32, i32) {
    %c0_i32 = arith.constant 0 : i32
    %c0_i32_0 = arith.constant 0 : i32
    %c0_i32_1 = arith.constant 0 : i32
    return %c0_i32, %c0_i32_0 : i32, i32
  }
  func.func @transform_9(%arg0: i32) -> (i32, i32) {
    %c0_i32 = arith.constant 0 : i32
    %c0_i32_0 = arith.constant 0 : i32
    %c0_i32_1 = arith.constant 0 : i32
    return %c0_i32, %c0_i32_0 : i32, i32
  }
  func.func @transform_10(%arg0: i32) -> (i32, i32) {
    %c0_i32 = arith.constant 0 : i32
    %c0_i32_0 = arith.constant 0 : i32
    %c0_i32_1 = arith.constant 0 : i32
    return %c0_i32, %c0_i32_0 : i32, i32
  }
  func.func @transform_11(%arg0: i32) -> (i32, i32) {
    %c0_i32 = arith.constant 0 : i32
    %c0_i32_0 = arith.constant 0 : i32
    return %arg0, %c0_i32 : i32, i32
  }
}

</mosaic_0001>

<bundles_post_ra>
// kernel: tpu_custom_call.1
= control target key start
LH: loop header
LB: loop body
LE: loop exit
PB: predicated region body
PF: predicated region fallthrough
CT: control target
= control target key end

     0   :  { %16 = vsyncpa [#allocation3], 0  ;;  %s4485_s0 = inlined_call_operand.hbm [shape: f32[8,64], index: 0, kind: input, shape index: {}]   ;;  %s4486_s1 = inlined_call_operand.hbm [shape: bf16[64,256], index: 1, kind: input, shape index: {}]   ;;  %s4487_s2 = inlined_call_operand.vmem [shape: f32[1,256], index: 2, kind: input, shape index: {}]   ;;  %s4488_s3 = inlined_call_operand.hbm [shape: bf16[256,512], index: 3, kind: input, shape index: {}]   ;;  %s4489_s4 = inlined_call_operand.vmem [shape: f32[1,512], index: 4, kind: input, shape index: {}]   ;;  %s4490_s5 = inlined_call_operand.hbm [shape: bf16[512,512], index: 5, kind: input, shape index: {}]   ;;  %s4491_s6 = inlined_call_operand.hbm [shape: f32[1,512], index: 6, kind: input, shape index: {}]   ;;  %s4492_s7 = inlined_call_operand.hbm [shape: bf16[512,256], index: 7, kind: input, shape index: {}]   ;;  %s4493_s8 = inlined_call_operand.hbm [shape: f32[1,256], index: 8, kind: input, shape index: {}]   ;;  %s4494_s9 = inlined_call_operand.hbm [shape: bf16[256,896], index: 9, kind: input, shape index: {}]   ;;  %s4495_s10 = inlined_call_operand.vmem [shape: f32[1,896], index: 10, kind: input, shape index: {}]   ;;  %s4496_s11 = inlined_call_operand.hbm [shape: f32[8,896], index: 11, kind: output, shape index: {}]  }
   0x1   :  { %17 = vsyncpa [#allocation6], 0 }
   0x2   :  { %18 = vsyncpa [#allocation9], 0 }
   0x3   :  { %19 = vsyncpa [#allocation12], 0 }
   0x4   :  { %20 = vsyncpa [#allocation15], 0 }
   0x5   :  { %21 = vsyncpa [#allocation4], 0  ;;  %s4320_s17 = smov [#allocation5]  }
   0x6   :  { %s37_s18 = sshll.u32 %s4320_s17, 4  ;;  %s38_s18 = int_to_ptr.vmem [resolvable:$true] %s37_s18 }
   0x7   :  { %s4136_s19 = scalar_lea.vmem %s38_s18, 1024  ;;  %p4141_p1 = scmp.lt.s32.totalorder %s38_s18, %s38_s18 }
   0x8   :  { %p4137_p0 = scmp.ne.s32.totalorder %s38_s18, %s4136_s19  ;;  %p4142_p2 = scmp.lt.s32.totalorder %s4136_s19, %s4136_s19 }
   0xa   :  { %p4143_p3 = por %p4142_p2, %p4141_p1 }
   0xc   :  { %p4144_p4 = pnand %p4143_p3, %p4137_p0 }
   0xe   :  { %4147 = shalt.err (!%p4144_p4)
}
   0xf   :  { %s4321_s20 = smov 128   ;;  %s4322_s21 = smov 8  }
  0x10   :  { %43 = dma.hbm_to_vmem [thread:$0]  %s4486_s1, 1024, %s38_s18, [#allocation6], %s4321_s20, %s4321_s20, %s4322_s21  }
  0x11   :  { %s4323_s24 = smov [#allocation8]   ;;  %s4324_s26 = smov [#allocation11]  }
  0x12   :  { %s65_s25 = sshll.u32 %s4323_s24, 4  ;;  %s87_s27 = sshll.u32 %s4324_s26, 4  ;;  %s66_s25 = int_to_ptr.vmem [resolvable:$true] %s65_s25  ;;  %s88_s27 = int_to_ptr.vmem [resolvable:$true] %s87_s27 }
  0x13   :  { %s4156_s28 = scalar_lea.vmem %s66_s25, 16384  ;;  %p4161_p6 = scmp.lt.s32.totalorder %s66_s25, %s66_s25 }
  0x14   :  { %p4157_p5 = scmp.ne.s32.totalorder %s66_s25, %s4156_s28  ;;  %p4162_p7 = scmp.lt.s32.totalorder %s4156_s28, %s4156_s28 }
  0x16   :  { %p4163_p8 = por %p4162_p7, %p4161_p6 }
  0x18   :  { %p4164_p9 = pnand %p4163_p8, %p4157_p5 }
  0x1a   :  { %4167 = shalt.err (!%p4164_p9)
}
  0x1b   :  { %s4325_s29 = smov 256   ;;  %s4326_s30 = smov 16  }
  0x1c   :  { %71 = dma.hbm_to_vmem [thread:$0]  %s4490_s5, 16384, %s66_s25, [#allocation9], %s4325_s29, %s4325_s29, %s4326_s30  }
  0x1d   :  { %s4176_s1 = scalar_lea.vmem %s88_s27, 8192  ;;  %p4181_p11 = scmp.lt.s32.totalorder %s88_s27, %s88_s27 }
  0x1e   :  { %p4177_p10 = scmp.ne.s32.totalorder %s88_s27, %s4176_s1  ;;  %p4182_p12 = scmp.lt.s32.totalorder %s4176_s1, %s4176_s1 }
  0x20   :  { %p4183_p13 = por %p4182_p12, %p4181_p11 }
  0x22   :  { %p4184_p0 = pnand %p4183_p13, %p4177_p10 }
  0x24   :  { %4187 = shalt.err (!%p4184_p0)
}
  0x25   :  { %93 = dma.hbm_to_vmem [thread:$0]  %s4492_s7, 8192, %s88_s27, [#allocation12], %s4321_s20, %s4321_s20, %s4322_s21  }
  0x26   :  { %s4327_s16 = smov [#allocation2]   ;;  %s4328_s18 = smov [#allocation7]  }
  0x27   :  { %s28_s17 = sshll.u32 %s4327_s16, 4  ;;  %s51_s19 = sshll.u32 %s4328_s18, 4  ;;  %s29_s17 = int_to_ptr.vmem [resolvable:$true] %s28_s17  ;;  %s52_s19 = int_to_ptr.vmem [resolvable:$true] %s51_s19 }
  0x28   :  { %s4196_s22 = scalar_lea.vmem %s29_s17, 128  ;;  %p4201_p2 = scmp.lt.s32.totalorder %s29_s17, %s29_s17 }
  0x29   :  { %p4197_p1 = scmp.ne.s32.totalorder %s29_s17, %s4196_s22  ;;  %p4202_p3 = scmp.lt.s32.totalorder %s4196_s22, %s4196_s22 }
  0x2b   :  { %p4203_p4 = por %p4202_p3, %p4201_p2 }
  0x2d   :  { %p4204_p5 = pnand %p4203_p4, %p4197_p1 }
  0x2f   :  { %4207 = shalt.err (!%p4204_p5)
}
  0x30   :  { %31 = dma.hbm_to_vmem [thread:$0]  %s4485_s0, 128, %s29_s17, [#allocation3]  }
  0x31   :  { %s4216_s24 = scalar_lea.vmem %s52_s19, 8192  ;;  %p4221_p7 = scmp.lt.s32.totalorder %s52_s19, %s52_s19 }
  0x32   :  { %p4217_p6 = scmp.ne.s32.totalorder %s52_s19, %s4216_s24  ;;  %p4222_p8 = scmp.lt.s32.totalorder %s4216_s24, %s4216_s24 }
  0x34   :  { %p4223_p9 = por %p4222_p8, %p4221_p7 }
  0x36   :  { %p4224_p10 = pnand %p4223_p9, %p4217_p6 }
  0x38   :  { %4227 = shalt.err (!%p4224_p10)
}
  0x39   :  { %57 = dma.hbm_to_vmem [thread:$0]  %s4488_s3, 8192, %s52_s19, [#allocation6], %s4325_s29, %s4325_s29, %s4326_s30  }
  0x3a   :  { %s4329_s21 = smov [#allocation10]   ;;  %s4330_s26 = smov [#allocation13]  }
  0x3b   :  { %s78_s25 = sshll.u32 %s4329_s21, 4  ;;  %s100_s0 = sshll.u32 %s4330_s26, 4  ;;  %s79_s25 = int_to_ptr.vmem [resolvable:$true] %s78_s25  ;;  %s101_s0 = int_to_ptr.vmem [resolvable:$true] %s100_s0 }
  0x3c   :  { %s4236_s27 = scalar_lea.vmem %s79_s25, 64  ;;  %p4241_p12 = scmp.lt.s32.totalorder %s79_s25, %s79_s25 }
  0x3d   :  { %p4237_p11 = scmp.ne.s32.totalorder %s79_s25, %s4236_s27  ;;  %p4242_p13 = scmp.lt.s32.totalorder %s4236_s27, %s4236_s27 }
  0x3f   :  { %p4243_p0 = por %p4242_p13, %p4241_p12 }
  0x41   :  { %p4244_p1 = pnand %p4243_p0, %p4237_p11 }
  0x43   :  { %4247 = shalt.err (!%p4244_p1)
}
  0x44   :  { %81 = dma.hbm_to_vmem [thread:$0]  %s4491_s6, 64, %s79_s25, [#allocation9]  }
  0x45   :  { %s4256_s13 = scalar_lea.vmem %s101_s0, 32  ;;  %p4261_p3 = scmp.lt.s32.totalorder %s101_s0, %s101_s0 }
  0x46   :  { %p4257_p2 = scmp.ne.s32.totalorder %s101_s0, %s4256_s13  ;;  %p4262_p4 = scmp.lt.s32.totalorder %s4256_s13, %s4256_s13 }
  0x48   :  { %p4263_p5 = por %p4262_p4, %p4261_p3 }
  0x4a   :  { %p4264_p6 = pnand %p4263_p5, %p4257_p2 }
  0x4c   :  { %4267 = shalt.err (!%p4264_p6)
}
  0x4d   :  { %103 = dma.hbm_to_vmem [thread:$0]  %s4493_s8, 32, %s101_s0, [#allocation12]  }
  0x4e   :  { %s4331_s30 = smov [#allocation14]  }
  0x4f   :  { %s109_s1 = sshll.u32 %s4331_s30, 4  ;;  %s110_s1 = int_to_ptr.vmem [resolvable:$true] %s109_s1 }
  0x50   :  { %s4276_s14 = scalar_lea.vmem %s110_s1, 14336  ;;  %p4281_p8 = scmp.lt.s32.totalorder %s110_s1, %s110_s1 }
  0x51   :  { %p4277_p7 = scmp.ne.s32.totalorder %s110_s1, %s4276_s14  ;;  %p4282_p9 = scmp.lt.s32.totalorder %s4276_s14, %s4276_s14 }
  0x53   :  { %p4283_p10 = por %p4282_p9, %p4281_p8 }
  0x55   :  { %p4284_p11 = pnand %p4283_p10, %p4277_p7 }
  0x57   :  { %4287 = shalt.err (!%p4284_p11)
}
  0x58   :  { %s4332_s6 = smov 448   ;;  %s4333_s15 = smov 28  }
  0x59   :  { %115 = dma.hbm_to_vmem [thread:$0]  %s4494_s9, 14336, %s110_s1, [#allocation15], %s4332_s6, %s4332_s6, %s4333_s15  }
  0x5a   :  { %4308 = dma.done.wait [#allocation3], 128  }
  0x5b   :  { %4309 = vsyncadd [#allocation3], 4294967168 }
  0x5c   :  { %4310 = dma.done.wait [#allocation6], 9216  }
  0x5d   :  { %4311 = vsyncadd [#allocation6], 4294958080 }
  0x5e   :  { %4312 = dma.done.wait [#allocation9], 16448  }
  0x5f   :  { %4313 = vsyncadd [#allocation9], 4294950848 }
  0x60   :  { %4314 = dma.done.wait [#allocation12], 8224  }
  0x61   :  { %4315 = vsyncadd [#allocation12], 4294959072 }
  0x62   :  { %4316 = dma.done.wait [#allocation15], 14336  }
  0x63   :  { %4317 = vsyncadd [#allocation15], 4294952960  ;;  %v4334_v0 = vmov 0   ;;  %v3558_v1 = vld [vmem:[#allocation5 + $0x34] ss:$8 sps:$4 sm:$0xff]   ;;  %vm205_vm0 = vcmask 523264  }
  0x64   :  { %241 = vmatprep.mubr.bf16.mxu0 %v4334_v0  ;;  %v3560_v2 = vld [vmem:[#allocation5 + $0x30] ss:$8 sps:$4 sm:$0xff]   ;;  %217 = vmatprep.subr.bf16.mxu0 %v3558_v1  ;;  %v3561_v3 = vld [vmem:[#allocation5 + $0x24] ss:$8 sps:$4 sm:$0xff]   ;;  %v3563_v4 = vld [vmem:[#allocation5 + $0x20] ss:$8 sps:$4 sm:$0xff]  }
  0x65   :  { %218 = vmatpush1.bf16.msra.mxu0 %v3560_v2  ;;  %v3564_v5 = vld [vmem:[#allocation5 + $0x14] ss:$8 sps:$4 sm:$0xff]   ;;  %v3566_v7 = vld [vmem:[#allocation5 + $0x10] ss:$8 sps:$4 sm:$0xff]   ;;  %v3567_v8 = vld [vmem:[#allocation5 + $0x4] ss:$8 sps:$4 sm:$0xff]  }
  0x66   :  { %219 = vmatprep.subr.bf16.mxu0 %v3561_v3  ;;  %v3570_v6 = vld [vmem:[#allocation7 + $0xe4] ss:$16 sps:$4 sm:$0xff]   ;;  %v3575_v9 = vld [vmem:[#allocation7 + $0xe0] ss:$16 sps:$4 sm:$0xff]   ;;  %v143_v12 = vld [vmem:[#allocation2] sm:$0xff] }
  0x67   :  { %662 = vmatprep.subr.bf16.mxu1 %v3570_v6  ;;  %v3576_v10 = vld [vmem:[#allocation7 + $0xc4] ss:$16 sps:$4 sm:$0xff]   ;;  %v3569_v11 = vld [vmem:[#allocation5] ss:$8 sps:$4 sm:$0xff]   ;;  %v3574_v15 = vld [vmem:[#allocation7 + $0xec] ss:$16 sps:$4 sm:$0xff]   ;;  %v144_v16 = vpack.c.bf16 %v143_v12, %v143_v12 }
  0x68   :  { %663 = vmatpush1.bf16.msra.mxu1 %v3575_v9  ;;  %v3581_v13 = vld [vmem:[#allocation7 + $0xc0] ss:$16 sps:$4 sm:$0xff]   ;;  %v3582_v14 = vld [vmem:[#allocation7 + $0xa4] ss:$16 sps:$4 sm:$0xff]   ;;  %v3572_v18 = vld [vmem:[#allocation7 + $0xe8] ss:$16 sps:$4 sm:$0xff]  }
  0x69   :  { %220 = vmatpush1.bf16.msra.mxu0 %v3563_v4  ;;  %664 = vmatprep.subr.bf16.mxu1 %v3576_v10  ;;  %v3587_v17 = vld [vmem:[#allocation7 + $0xa0] ss:$16 sps:$4 sm:$0xff]   ;;  %v3588_v19 = vld [vmem:[#allocation7 + $0x84] ss:$16 sps:$4 sm:$0xff]   ;;  %v3580_v20 = vld [vmem:[#allocation7 + $0xcc] ss:$16 sps:$4 sm:$0xff]  }
  0x6a   :  { %221 = vmatprep.subr.bf16.mxu0 %v3564_v5  ;;  %v3578_v21 = vld [vmem:[#allocation7 + $0xc8] ss:$16 sps:$4 sm:$0xff]   ;;  %v3593_v22 = vld [vmem:[#allocation7 + $0x80] ss:$16 sps:$4 sm:$0xff]   ;;  %v3594_v23 = vld [vmem:[#allocation7 + $0x64] ss:$16 sps:$4 sm:$0xff]  }
  0x6b   :  { %v3586_v24 = vld [vmem:[#allocation7 + $0xac] ss:$16 sps:$4 sm:$0xff]   ;;  %v3599_v25 = vld [vmem:[#allocation7 + $0x60] ss:$16 sps:$4 sm:$0xff]   ;;  %v3584_v26 = vld [vmem:[#allocation7 + $0xa8] ss:$16 sps:$4 sm:$0xff]  }
  0x6c   :  { %665 = vmatpush1.bf16.msra.mxu1 %v3581_v13  ;;  %v3600_v27 = vld [vmem:[#allocation7 + $0x44] ss:$16 sps:$4 sm:$0xff]   ;;  %v3592_v28 = vld [vmem:[#allocation7 + $0x8c] ss:$16 sps:$4 sm:$0xff]   ;;  %v3590_v29 = vld [vmem:[#allocation7 + $0x88] ss:$16 sps:$4 sm:$0xff]   ;;  %v155_v13 = vlaneseq }
  0x6d   :  { %222 = vmatpush1.bf16.msra.mxu0 %v3566_v7  ;;  %666 = vmatprep.subr.bf16.mxu1 %v3582_v14  ;;  %v3605_v30 = vld [vmem:[#allocation7 + $0x40] ss:$16 sps:$4 sm:$0xff]   ;;  %v3606_v31 = vld [vmem:[#allocation7 + $0x24] ss:$16 sps:$4 sm:$0xff]   ;;  %v3598_v32 = vld [vmem:[#allocation7 + $0x6c] ss:$16 sps:$4 sm:$0xff]  }
  0x6e   :  { %223 = vmatprep.subr.bf16.mxu0 %v3567_v8  ;;  %v3611_v33 = vld [vmem:[#allocation7 + $0x20] ss:$16 sps:$4 sm:$0xff]   ;;  %v3596_v34 = vld [vmem:[#allocation7 + $0x68] ss:$16 sps:$4 sm:$0xff]   ;;  %v3612_v35 = vld [vmem:[#allocation7 + $0x4] ss:$16 sps:$4 sm:$0xff]  }
  0x6f   :  { %v3604_v36 = vld [vmem:[#allocation7 + $0x4c] ss:$16 sps:$4 sm:$0xff]   ;;  %v3602_v37 = vld [vmem:[#allocation7 + $0x48] ss:$16 sps:$4 sm:$0xff]   ;;  %v3617_v38 = vld [vmem:[#allocation7] ss:$16 sps:$4 sm:$0xff]  }
  0x70   :  { %667 = vmatpush1.bf16.msra.mxu1 %v3587_v17  ;;  %v3618_v39 = vld [vmem:[#allocation7 + $0x1e4] ss:$16 sps:$4 sm:$0xff]   ;;  %v3610_v40 = vld [vmem:[#allocation7 + $0x2c] ss:$16 sps:$4 sm:$0xff]   ;;  %v3623_v41 = vld [vmem:[#allocation7 + $0x1e0] ss:$16 sps:$4 sm:$0xff]  }
  0x71   :  { %224 = vmatpush1.bf16.msra.mxu0 %v3569_v11  ;;  %668 = vmatprep.subr.bf16.mxu1 %v3588_v19  ;;  %v3608_v42 = vld [vmem:[#allocation7 + $0x28] ss:$16 sps:$4 sm:$0xff]   ;;  %v3624_v43 = vld [vmem:[#allocation7 + $0x1c4] ss:$16 sps:$4 sm:$0xff]   ;;  %v3616_v44 = vld [vmem:[#allocation7 + $0xc] ss:$16 sps:$4 sm:$0xff]  }
  0x72   :  { %703 = vmatprep.subr.bf16.mxu0 %v3574_v15  ;;  %v3629_v45 = vld [vmem:[#allocation7 + $0x1c0] ss:$16 sps:$4 sm:$0xff]   ;;  %v3614_v46 = vld [vmem:[#allocation7 + $0x8] ss:$16 sps:$4 sm:$0xff]   ;;  %v3630_v47 = vld [vmem:[#allocation7 + $0x1a4] ss:$16 sps:$4 sm:$0xff]  }
  0x73   :  { %v3622_v48 = vld [vmem:[#allocation7 + $0x1ec] ss:$16 sps:$4 sm:$0xff]   ;;  %v3635_v49 = vld [vmem:[#allocation7 + $0x1a0] ss:$16 sps:$4 sm:$0xff]   ;;  %v3620_v50 = vld [vmem:[#allocation7 + $0x1e8] ss:$16 sps:$4 sm:$0xff]  }
  0x74   :  { %3151 = vmatmul.mubr.msk.bf16.vlgmr.msra.gmra.mxu0 %vm205_vm0, %v144_v16  ;;  %669 = vmatpush1.bf16.msra.mxu1 %v3593_v22  ;;  %v3636_v51 = vld [vmem:[#allocation7 + $0x184] ss:$16 sps:$4 sm:$0xff]   ;;  %v3628_v52 = vld [vmem:[#allocation7 + $0x1cc] ss:$16 sps:$4 sm:$0xff]   ;;  %v3641_v53 = vld [vmem:[#allocation7 + $0x180] ss:$16 sps:$4 sm:$0xff]  }
  0x75   :  { %704 = vmatpush1.bf16.msra.mxu0 %v3572_v18  ;;  %670 = vmatprep.subr.bf16.mxu1 %v3594_v23  ;;  %v3626_v54 = vld [vmem:[#allocation7 + $0x1c8] ss:$16 sps:$4 sm:$0xff]   ;;  %v3642_v55 = vld [vmem:[#allocation7 + $0x164] ss:$16 sps:$4 sm:$0xff]   ;;  %v3634_v56 = vld [vmem:[#allocation7 + $0x1ac] ss:$16 sps:$4 sm:$0xff]  }
  0x76   :  { %705 = vmatprep.subr.bf16.mxu0 %v3580_v20  ;;  %v3647_v57 = vld [vmem:[#allocation7 + $0x160] ss:$16 sps:$4 sm:$0xff]   ;;  %v3632_v58 = vld [vmem:[#allocation7 + $0x1a8] ss:$16 sps:$4 sm:$0xff]   ;;  %v3640_v59 = vld [vmem:[#allocation7 + $0x18c] ss:$16 sps:$4 sm:$0xff]  }
  0x77   :  { %v3638_v60 = vld [vmem:[#allocation7 + $0x188] ss:$16 sps:$4 sm:$0xff]   ;;  %v3646_v61 = vld [vmem:[#allocation7 + $0x16c] ss:$16 sps:$4 sm:$0xff]   ;;  %v3648_v63 = vld [vmem:[#allocation7 + $0x144] ss:$16 sps:$4 sm:$0xff]  }
  0x78   :  { %671 = vmatpush1.bf16.msra.mxu1 %v3599_v25  ;;  %v3644_v62 = vld [vmem:[#allocation7 + $0x168] ss:$16 sps:$4 sm:$0xff]   ;;  %v3652_v0 = vld [vmem:[#allocation7 + $0x14c] ss:$16 sps:$4 sm:$0xff]   ;;  %v3653_v2 = vld [vmem:[#allocation7 + $0x140] ss:$16 sps:$4 sm:$0xff]  }
  0x79   :  { %706 = vmatpush1.bf16.msra.mxu0 %v3578_v21  ;;  %672 = vmatprep.subr.bf16.mxu1 %v3600_v27  ;;  %v3650_v1 = vld [vmem:[#allocation7 + $0x148] ss:$16 sps:$4 sm:$0xff]   ;;  %v3654_v3 = vld [vmem:[#allocation7 + $0x124] ss:$16 sps:$4 sm:$0xff]   ;;  %v3658_v4 = vld [vmem:[#allocation7 + $0x12c] ss:$16 sps:$4 sm:$0xff]  }
  0x7a   :  { %707 = vmatprep.subr.bf16.mxu0 %v3586_v24  ;;  %v3656_v5 = vld [vmem:[#allocation7 + $0x128] ss:$16 sps:$4 sm:$0xff]   ;;  %v3659_v6 = vld [vmem:[#allocation7 + $0x120] ss:$16 sps:$4 sm:$0xff]   ;;  %v3660_v7 = vld [vmem:[#allocation7 + $0x104] ss:$16 sps:$4 sm:$0xff]  }
  0x7b   :  { %v3664_v8 = vld [vmem:[#allocation7 + $0x10c] ss:$16 sps:$4 sm:$0xff]   ;;  %v3662_v9 = vld [vmem:[#allocation7 + $0x108] ss:$16 sps:$4 sm:$0xff]   ;;  %v3665_v10 = vld [vmem:[#allocation7 + $0x100] ss:$16 sps:$4 sm:$0xff]  }
  0x7c   :  { %673 = vmatpush1.bf16.msra.mxu1 %v3605_v30  ;;  %v3668_v11 = vld [vmem:[#allocation8 + $0xe4] ss:$16 sps:$4 sm:$0xff]   ;;  %v4426_v14 = vshrl.u32 %v155_v13, 7  ;;  %v153_v16 = vld [vmem:[%s4487_s2] sm:$0x3] }
  0x7d   :  { %708 = vmatpush1.bf16.msra.mxu0 %v3584_v26  ;;  %674 = vmatprep.subr.bf16.mxu1 %v3606_v31  ;;  %v3671_v12 = vld [vmem:[#allocation8 + $0x2e4] ss:$16 sps:$4 sm:$0xff]   ;;  %v3666_v31 = vld [vmem:[#allocation8 + $0xe0] ss:$16 sps:$4 sm:$0xff]  }
  0x7e   :  { %709 = vmatprep.subr.bf16.mxu0 %v3592_v28  ;;  %v4429_v15 = vsub.s32 0, %v4426_v14  ;;  %v4435_v17 = vsub.s32 1, %v4426_v14  ;;  %v3735_v13 = vld [vmem:[#allocation8 + $0x380] ss:$16 sps:$4 sm:$0xff]  }
  0x80   :  { %675 = vmatpush1.bf16.msra.mxu1 %v3611_v33  ;;  %v158_v18 = vrot.slane %v153_v16, %v4429_v15  ;;  %v162_v19 = vrot.slane %v153_v16, %v4435_v17  ;;  %v3740_v16 = vld [vmem:[#allocation8 + $0x164] ss:$16 sps:$4 sm:$0xff]  }
  0x81   :  { %710 = vmatpush1.bf16.msra.mxu0 %v3590_v29  ;;  %676 = vmatprep.subr.bf16.mxu1 %v3612_v35  ;;  %v3677_v35 = vld [vmem:[#allocation8 + $0x2c4] ss:$16 sps:$4 sm:$0xff]  }
  0x82   :  { %711 = vmatprep.subr.bf16.mxu0 %v3598_v32  ;;  %v3669_v32 = vld [vmem:[#allocation8 + $0x2e0] ss:$16 sps:$4 sm:$0xff]  }
  0x84   :  { %677 = vmatpush1.bf16.msra.mxu1 %v3617_v38  ;;  %v3680_v38 = vld [vmem:[#allocation8 + $0xa4] ss:$16 sps:$4 sm:$0xff]  }
  0x85   :  { %712 = vmatpush1.bf16.msra.mxu0 %v3596_v34  ;;  %678 = vmatprep.subr.bf16.mxu1 %v3618_v39  ;;  %v3674_v34 = vld [vmem:[#allocation8 + $0xc4] ss:$16 sps:$4 sm:$0xff]  }
  0x86   :  { %713 = vmatprep.subr.bf16.mxu0 %v3604_v36  ;;  %v3672_v36 = vld [vmem:[#allocation8 + $0xc0] ss:$16 sps:$4 sm:$0xff]   ;;  %v3683_v39 = vld [vmem:[#allocation8 + $0x2a4] ss:$16 sps:$4 sm:$0xff]  }
  0x88   :  { %679 = vmatpush2.bf16.msra.mxu1 %v3623_v41  ;;  %v3681_v41 = vld [vmem:[#allocation8 + $0x2a0] ss:$16 sps:$4 sm:$0xff]  }
  0x89   :  { %714 = vmatpush1.bf16.msra.mxu0 %v3602_v37  ;;  %680 = vmatprep.subr.bf16.mxu1 %v3624_v43  ;;  %v3675_v37 = vld [vmem:[#allocation8 + $0x2c0] ss:$16 sps:$4 sm:$0xff]   ;;  %v3689_v43 = vld [vmem:[#allocation8 + $0x284] ss:$16 sps:$4 sm:$0xff]  }
  0x8a   :  { %715 = vmatprep.subr.bf16.mxu0 %v3610_v40  ;;  %v3678_v40 = vld [vmem:[#allocation8 + $0xa0] ss:$16 sps:$4 sm:$0xff]  }
  0x8c   :  { %681 = vmatpush2.bf16.msra.mxu1 %v3629_v45  ;;  %v3687_v45 = vld [vmem:[#allocation8 + $0x280] ss:$16 sps:$4 sm:$0xff]  }
  0x8d   :  { %716 = vmatpush1.bf16.msra.mxu0 %v3608_v42  ;;  %682 = vmatprep.subr.bf16.mxu1 %v3630_v47  ;;  %v3686_v42 = vld [vmem:[#allocation8 + $0x84] ss:$16 sps:$4 sm:$0xff]  }
  0x8e   :  { %717 = vmatprep.subr.bf16.mxu0 %v3616_v44  ;;  %v3684_v44 = vld [vmem:[#allocation8 + $0x80] ss:$16 sps:$4 sm:$0xff]   ;;  %v3695_v47 = vld [vmem:[#allocation8 + $0x264] ss:$16 sps:$4 sm:$0xff]  }
  0x90   :  { %683 = vmatpush2.bf16.msra.mxu1 %v3635_v49  ;;  %v3693_v49 = vld [vmem:[#allocation8 + $0x260] ss:$16 sps:$4 sm:$0xff]  }
  0x91   :  { %718 = vmatpush1.bf16.msra.mxu0 %v3614_v46  ;;  %684 = vmatprep.subr.bf16.mxu1 %v3636_v51  ;;  %v3692_v46 = vld [vmem:[#allocation8 + $0x64] ss:$16 sps:$4 sm:$0xff]  }
  0x92   :  { %719 = vmatprep.subr.bf16.mxu0 %v3622_v48  ;;  %v3690_v48 = vld [vmem:[#allocation8 + $0x60] ss:$16 sps:$4 sm:$0xff]   ;;  %v3701_v51 = vld [vmem:[#allocation8 + $0x244] ss:$16 sps:$4 sm:$0xff]  }
  0x94   :  { %685 = vmatpush2.bf16.msra.mxu1 %v3641_v53  ;;  %v3699_v53 = vld [vmem:[#allocation8 + $0x240] ss:$16 sps:$4 sm:$0xff]  }
  0x95   :  { %720 = vmatpush2.bf16.msra.mxu0 %v3620_v50  ;;  %686 = vmatprep.subr.bf16.mxu1 %v3642_v55  ;;  %v3698_v50 = vld [vmem:[#allocation8 + $0x44] ss:$16 sps:$4 sm:$0xff]  }
  0x96   :  { %721 = vmatprep.subr.bf16.mxu0 %v3628_v52  ;;  %v3696_v52 = vld [vmem:[#allocation8 + $0x40] ss:$16 sps:$4 sm:$0xff]   ;;  %v3707_v55 = vld [vmem:[#allocation8 + $0x224] ss:$16 sps:$4 sm:$0xff]  }
  0x98   :  { %687 = vmatpush2.bf16.msra.mxu1 %v3647_v57  ;;  %v3705_v57 = vld [vmem:[#allocation8 + $0x220] ss:$16 sps:$4 sm:$0xff]  }
  0x99   :  { %722 = vmatpush2.bf16.msra.mxu0 %v3626_v54  ;;  %688 = vmatprep.subr.bf16.mxu1 %v3648_v63  ;;  %v3704_v54 = vld [vmem:[#allocation8 + $0x24] ss:$16 sps:$4 sm:$0xff]  }
  0x9a   :  { %723 = vmatprep.subr.bf16.mxu0 %v3634_v56  ;;  %v3702_v56 = vld [vmem:[#allocation8 + $0x20] ss:$16 sps:$4 sm:$0xff]   ;;  %v3719_v63 = vld [vmem:[#allocation8 + $0x3e4] ss:$16 sps:$4 sm:$0xff]  }
  0x9c   :  { %689 = vmatpush2.bf16.msra.mxu1 %v3653_v2  ;;  %v3722_v2 = vld [vmem:[#allocation8 + $0x1c4] ss:$16 sps:$4 sm:$0xff]  }
  0x9d   :  { %724 = vmatpush2.bf16.msra.mxu0 %v3632_v58  ;;  %690 = vmatprep.subr.bf16.mxu1 %v3654_v3  ;;  %v3710_v58 = vld [vmem:[#allocation8 + $0x4] ss:$16 sps:$4 sm:$0xff]  }
  0x9e   :  { %725 = vmatprep.subr.bf16.mxu0 %v3640_v59  ;;  %v3713_v59 = vld [vmem:[#allocation8 + $0x204] ss:$16 sps:$4 sm:$0xff]  }
  0x9f   :  { %v3725_v3 = vld [vmem:[#allocation8 + $0x3c4] ss:$16 sps:$4 sm:$0xff]  }
  0xa0   :  { %691 = vmatpush2.bf16.msra.mxu1 %v3659_v6  ;;  %v3728_v6 = vld [vmem:[#allocation8 + $0x1a4] ss:$16 sps:$4 sm:$0xff]  }
  0xa1   :  { %726 = vmatpush2.bf16.msra.mxu0 %v3638_v60  ;;  %692 = vmatprep.subr.bf16.mxu1 %v3660_v7  ;;  %v3708_v60 = vld [vmem:[#allocation8] ss:$16 sps:$4 sm:$0xff]   ;;  %v3731_v7 = vld [vmem:[#allocation8 + $0x3a4] ss:$16 sps:$4 sm:$0xff]  }
  0xa2   :  { %727 = vmatprep.subr.bf16.mxu0 %v3646_v61  ;;  %v3711_v61 = vld [vmem:[#allocation8 + $0x200] ss:$16 sps:$4 sm:$0xff]  }
  0xa4   :  { %693 = vmatpush2.bf16.msra.mxu1 %v3665_v10  ;;  %v3734_v10 = vld [vmem:[#allocation8 + $0x184] ss:$16 sps:$4 sm:$0xff]  }
  0xa5   :  { %728 = vmatpush2.bf16.msra.mxu0 %v3644_v62  ;;  %1546 = vmatprep.subr.bf16.mxu1 %v3668_v11  ;;  %v3716_v62 = vld [vmem:[#allocation8 + $0x1e4] ss:$16 sps:$4 sm:$0xff]  }
  0xa6   :  { %729 = vmatprep.subr.bf16.mxu0 %v3652_v0  ;;  %v3714_v0 = vld [vmem:[#allocation8 + $0x1e0] ss:$16 sps:$4 sm:$0xff]   ;;  %v3737_v11 = vld [vmem:[#allocation8 + $0x384] ss:$16 sps:$4 sm:$0xff]  }
  0xa9   :  { %730 = vmatpush2.bf16.msra.mxu0 %v3650_v1  ;;  %v3717_v1 = vld [vmem:[#allocation8 + $0x3e0] ss:$16 sps:$4 sm:$0xff]  }
  0xaa   :  { %731 = vmatprep.subr.bf16.mxu0 %v3658_v4  ;;  %v3720_v4 = vld [vmem:[#allocation8 + $0x1c0] ss:$16 sps:$4 sm:$0xff]  }
  0xad   :  { %732 = vmatpush2.bf16.msra.mxu0 %v3656_v5  ;;  %v3723_v5 = vld [vmem:[#allocation8 + $0x3c0] ss:$16 sps:$4 sm:$0xff]  }
  0xae   :  { %733 = vmatprep.subr.bf16.mxu0 %v3664_v8  ;;  %v3726_v8 = vld [vmem:[#allocation8 + $0x1a0] ss:$16 sps:$4 sm:$0xff]  }
  0xb1   :  { %734 = vmatpush2.bf16.msra.mxu0 %v3662_v9  ;;  %v3729_v9 = vld [vmem:[#allocation8 + $0x3a0] ss:$16 sps:$4 sm:$0xff]  }
  0xb2   :  { %1587 = vmatprep.subr.bf16.mxu0 %v3671_v12  ;;  %v3732_v12 = vld [vmem:[#allocation8 + $0x180] ss:$16 sps:$4 sm:$0xff]  }
 0x134   :  { %v243_v20 = vpop.f32.mrf.mxu0 }
 0x135   :  { %v244_v21 = vadd.f32 %v243_v20, %v158_v18  ;;  %v3743_v18 = vld [vmem:[#allocation8 + $0x364] ss:$16 sps:$4 sm:$0xff]   ;;  %v3741_v20 = vld [vmem:[#allocation8 + $0x360] ss:$16 sps:$4 sm:$0xff]  }
 0x136   :  { %v245_v22 = vpop.f32.mrf.mxu0 }
 0x137   :  { %v250_v23 = vmul.f32 0.01, %v244_v21  ;;  %v246_v24 = vadd.f32 %v245_v22, %v162_v19  ;;  %v3738_v19 = vld [vmem:[#allocation8 + $0x160] ss:$16 sps:$4 sm:$0xff]   ;;  %v3749_v22 = vld [vmem:[#allocation8 + $0x344] ss:$16 sps:$4 sm:$0xff]  }
 0x138   :  { %v247_v25 = vpop.f32.mrf.mxu0 }
 0x139   :  { %v251_v26 = vmul.f32 0.01, %v246_v24  ;;  %v252_v27 = vmax.f32 %v244_v21, %v250_v23  ;;  %v3746_v21 = vld [vmem:[#allocation8 + $0x144] ss:$16 sps:$4 sm:$0xff]   ;;  %v3744_v23 = vld [vmem:[#allocation8 + $0x140] ss:$16 sps:$4 sm:$0xff]  }
 0x13a   :  { %v248_v28 = vpop.f32.mrf.mxu0  ;;  %v3752_v25 = vld [vmem:[#allocation8 + $0x124] ss:$16 sps:$4 sm:$0xff]  }
 0x13b   :  { %v253_v29 = vmax.f32 %v246_v24, %v251_v26  ;;  %v254_v33 = vpack.c.bf16 %v252_v27, %v252_v27  ;;  %v3747_v24 = vld [vmem:[#allocation8 + $0x340] ss:$16 sps:$4 sm:$0xff]   ;;  %v3755_v26 = vld [vmem:[#allocation8 + $0x324] ss:$16 sps:$4 sm:$0xff]  }
 0x13c   :  { %v3750_v27 = vld [vmem:[#allocation8 + $0x120] ss:$16 sps:$4 sm:$0xff]  }
 0x13d   :  { %v255_v30 = vpack.c.bf16 %v253_v29, %v253_v29  ;;  %v3753_v28 = vld [vmem:[#allocation8 + $0x320] ss:$16 sps:$4 sm:$0xff]   ;;  %v3758_v29 = vld [vmem:[#allocation8 + $0x104] ss:$16 sps:$4 sm:$0xff]  }
 0x13f   :  { %694 = vmatprep.mubr.bf16.mxu1 %v255_v30  ;;  %735 = vmatprep.mubr.bf16.mxu0 %v255_v30  ;;  %v3761_v30 = vld [vmem:[#allocation8 + $0x304] ss:$16 sps:$4 sm:$0xff]  }
 0x140   :  { %695 = vmatmul.mubr.bf16.vlgmr.msra.gmra.mxu1 %v254_v33  ;;  %736 = vmatmul.mubr.bf16.vlgmr.msra.gmra.mxu0 %v254_v33  ;;  %v3764_v33 = vld [vmem:[#allocation8 + $0xec] ss:$16 sps:$4 sm:$0xff]  }
 0x141   :  { %1547 = vmatpush1.bf16.msra.mxu1 %v3666_v31  ;;  %1588 = vmatpush1.bf16.msra.mxu0 %v3669_v32  ;;  %v3756_v31 = vld [vmem:[#allocation8 + $0x100] ss:$16 sps:$4 sm:$0xff]  }
 0x142   :  { %1548 = vmatprep.subr.bf16.mxu1 %v3674_v34  ;;  %1589 = vmatprep.subr.bf16.mxu0 %v3677_v35  ;;  %v3759_v32 = vld [vmem:[#allocation8 + $0x300] ss:$16 sps:$4 sm:$0xff]   ;;  %v3767_v34 = vld [vmem:[#allocation8 + $0x2ec] ss:$16 sps:$4 sm:$0xff]   ;;  %v4440_v35 = vsub.s32 2, %v4426_v14 }
 0x145   :  { %1549 = vmatpush1.bf16.msra.mxu1 %v3672_v36  ;;  %1590 = vmatpush1.bf16.msra.mxu0 %v3675_v37  ;;  %v320_v36 = vld [vmem:[%s4489_s4] sm:$0xf]  ;;  %v4446_v37 = vsub.s32 3, %v4426_v14 }
 0x146   :  { %1550 = vmatprep.subr.bf16.mxu1 %v3680_v38  ;;  %1591 = vmatprep.subr.bf16.mxu0 %v3683_v39  ;;  %v325_v38 = vrot.slane %v320_v36, %v4429_v15  ;;  %v333_v39 = vrot.slane %v320_v36, %v4440_v35 }
 0x149   :  { %1551 = vmatpush1.bf16.msra.mxu1 %v3678_v40  ;;  %1592 = vmatpush1.bf16.msra.mxu0 %v3681_v41  ;;  %v329_v40 = vrot.slane %v320_v36, %v4435_v17  ;;  %v337_v41 = vrot.slane %v320_v36, %v4446_v37  ;;  %v3812_v36 = vld [vmem:[#allocation8 + $0x1ec] ss:$16 sps:$4 sm:$0xff]  }
 0x14a   :  { %1552 = vmatprep.subr.bf16.mxu1 %v3686_v42  ;;  %1593 = vmatprep.subr.bf16.mxu0 %v3689_v43 }
 0x14d   :  { %1553 = vmatpush1.bf16.msra.mxu1 %v3684_v44  ;;  %1594 = vmatpush1.bf16.msra.mxu0 %v3687_v45 }
 0x14e   :  { %1554 = vmatprep.subr.bf16.mxu1 %v3692_v46  ;;  %1595 = vmatprep.subr.bf16.mxu0 %v3695_v47 }
 0x151   :  { %1555 = vmatpush1.bf16.msra.mxu1 %v3690_v48  ;;  %1596 = vmatpush1.bf16.msra.mxu0 %v3693_v49 }
 0x152   :  { %1556 = vmatprep.subr.bf16.mxu1 %v3698_v50  ;;  %1597 = vmatprep.subr.bf16.mxu0 %v3701_v51 }
 0x155   :  { %1557 = vmatpush1.bf16.msra.mxu1 %v3696_v52  ;;  %1598 = vmatpush1.bf16.msra.mxu0 %v3699_v53 }
 0x156   :  { %1558 = vmatprep.subr.bf16.mxu1 %v3704_v54  ;;  %1599 = vmatprep.subr.bf16.mxu0 %v3707_v55 }
 0x159   :  { %1559 = vmatpush1.bf16.msra.mxu1 %v3702_v56  ;;  %1600 = vmatpush1.bf16.msra.mxu0 %v3705_v57 }
 0x15a   :  { %1560 = vmatprep.subr.bf16.mxu1 %v3710_v58  ;;  %1601 = vmatprep.subr.bf16.mxu0 %v3713_v59 }
 0x15d   :  { %1561 = vmatpush1.bf16.msra.mxu1 %v3708_v60  ;;  %1602 = vmatpush1.bf16.msra.mxu0 %v3711_v61 }
 0x15e   :  { %1562 = vmatprep.subr.bf16.mxu1 %v3716_v62  ;;  %1603 = vmatprep.subr.bf16.mxu0 %v3719_v63 }
 0x161   :  { %1563 = vmatpush2.bf16.msra.mxu1 %v3714_v0  ;;  %1604 = vmatpush2.bf16.msra.mxu0 %v3717_v1  ;;  %v3762_v0 = vld [vmem:[#allocation8 + $0xe8] ss:$16 sps:$4 sm:$0xff]  }
 0x162   :  { %1564 = vmatprep.subr.bf16.mxu1 %v3722_v2  ;;  %1605 = vmatprep.subr.bf16.mxu0 %v3725_v3  ;;  %v3765_v1 = vld [vmem:[#allocation8 + $0x2e8] ss:$16 sps:$4 sm:$0xff]  }
 0x165   :  { %1565 = vmatpush2.bf16.msra.mxu1 %v3720_v4  ;;  %1606 = vmatpush2.bf16.msra.mxu0 %v3723_v5  ;;  %v3770_v4 = vld [vmem:[#allocation8 + $0xcc] ss:$16 sps:$4 sm:$0xff]  }
 0x166   :  { %1566 = vmatprep.subr.bf16.mxu1 %v3728_v6  ;;  %1607 = vmatprep.subr.bf16.mxu0 %v3731_v7  ;;  %v3773_v5 = vld [vmem:[#allocation8 + $0x2cc] ss:$16 sps:$4 sm:$0xff]   ;;  %v3768_v6 = vld [vmem:[#allocation8 + $0xc8] ss:$16 sps:$4 sm:$0xff]  }
 0x167   :  { %v3771_v7 = vld [vmem:[#allocation8 + $0x2c8] ss:$16 sps:$4 sm:$0xff]  }
 0x169   :  { %1567 = vmatpush2.bf16.msra.mxu1 %v3726_v8  ;;  %1608 = vmatpush2.bf16.msra.mxu0 %v3729_v9  ;;  %v3776_v8 = vld [vmem:[#allocation8 + $0xac] ss:$16 sps:$4 sm:$0xff]  }
 0x16a   :  { %1568 = vmatprep.subr.bf16.mxu1 %v3734_v10  ;;  %1609 = vmatprep.subr.bf16.mxu0 %v3737_v11  ;;  %v3779_v9 = vld [vmem:[#allocation8 + $0x2ac] ss:$16 sps:$4 sm:$0xff]   ;;  %v3774_v10 = vld [vmem:[#allocation8 + $0xa8] ss:$16 sps:$4 sm:$0xff]  }
 0x16b   :  { %v3777_v11 = vld [vmem:[#allocation8 + $0x2a8] ss:$16 sps:$4 sm:$0xff]  }
 0x16d   :  { %1569 = vmatpush2.bf16.msra.mxu1 %v3732_v12  ;;  %1610 = vmatpush2.bf16.msra.mxu0 %v3735_v13  ;;  %v3782_v12 = vld [vmem:[#allocation8 + $0x8c] ss:$16 sps:$4 sm:$0xff]  }
 0x16e   :  { %1570 = vmatprep.subr.bf16.mxu1 %v3740_v16  ;;  %1611 = vmatprep.subr.bf16.mxu0 %v3743_v18  ;;  %v3785_v13 = vld [vmem:[#allocation8 + $0x28c] ss:$16 sps:$4 sm:$0xff]   ;;  %v3780_v16 = vld [vmem:[#allocation8 + $0x88] ss:$16 sps:$4 sm:$0xff]  }
 0x16f   :  { %v3783_v18 = vld [vmem:[#allocation8 + $0x288] ss:$16 sps:$4 sm:$0xff]  }
 0x171   :  { %1571 = vmatpush2.bf16.msra.mxu1 %v3738_v19  ;;  %1612 = vmatpush2.bf16.msra.mxu0 %v3741_v20  ;;  %v3788_v19 = vld [vmem:[#allocation8 + $0x6c] ss:$16 sps:$4 sm:$0xff]  }
 0x172   :  { %1572 = vmatprep.subr.bf16.mxu1 %v3746_v21  ;;  %1613 = vmatprep.subr.bf16.mxu0 %v3749_v22  ;;  %v3791_v20 = vld [vmem:[#allocation8 + $0x26c] ss:$16 sps:$4 sm:$0xff]   ;;  %v3786_v21 = vld [vmem:[#allocation8 + $0x68] ss:$16 sps:$4 sm:$0xff]  }
 0x173   :  { %v3789_v22 = vld [vmem:[#allocation8 + $0x268] ss:$16 sps:$4 sm:$0xff]  }
 0x175   :  { %1573 = vmatpush2.bf16.msra.mxu1 %v3744_v23  ;;  %1614 = vmatpush2.bf16.msra.mxu0 %v3747_v24  ;;  %v3794_v23 = vld [vmem:[#allocation8 + $0x4c] ss:$16 sps:$4 sm:$0xff]  }
 0x176   :  { %1574 = vmatprep.subr.bf16.mxu1 %v3752_v25  ;;  %1615 = vmatprep.subr.bf16.mxu0 %v3755_v26  ;;  %v3797_v24 = vld [vmem:[#allocation8 + $0x24c] ss:$16 sps:$4 sm:$0xff]   ;;  %v3792_v25 = vld [vmem:[#allocation8 + $0x48] ss:$16 sps:$4 sm:$0xff]  }
 0x177   :  { %v3795_v26 = vld [vmem:[#allocation8 + $0x248] ss:$16 sps:$4 sm:$0xff]  }
 0x179   :  { %1575 = vmatpush2.bf16.msra.mxu1 %v3750_v27  ;;  %1616 = vmatpush2.bf16.msra.mxu0 %v3753_v28  ;;  %v3800_v27 = vld [vmem:[#allocation8 + $0x2c] ss:$16 sps:$4 sm:$0xff]  }
 0x17a   :  { %1576 = vmatprep.subr.bf16.mxu1 %v3758_v29  ;;  %1617 = vmatprep.subr.bf16.mxu0 %v3761_v30  ;;  %v3803_v28 = vld [vmem:[#allocation8 + $0x22c] ss:$16 sps:$4 sm:$0xff]   ;;  %v3798_v29 = vld [vmem:[#allocation8 + $0x28] ss:$16 sps:$4 sm:$0xff]  }
 0x17b   :  { %v3801_v30 = vld [vmem:[#allocation8 + $0x228] ss:$16 sps:$4 sm:$0xff]  }
 0x17d   :  { %1577 = vmatpush2.bf16.msra.mxu1 %v3756_v31  ;;  %1618 = vmatpush2.bf16.msra.mxu0 %v3759_v32  ;;  %v3806_v31 = vld [vmem:[#allocation8 + $0xc] ss:$16 sps:$4 sm:$0xff]  }
 0x17e   :  { %1628 = vmatprep.subr.bf16.mxu1 %v3764_v33  ;;  %1669 = vmatprep.subr.bf16.mxu0 %v3767_v34  ;;  %v3809_v32 = vld [vmem:[#allocation8 + $0x20c] ss:$16 sps:$4 sm:$0xff]   ;;  %v3804_v33 = vld [vmem:[#allocation8 + $0x8] ss:$16 sps:$4 sm:$0xff]  }
 0x17f   :  { %v3807_v34 = vld [vmem:[#allocation8 + $0x208] ss:$16 sps:$4 sm:$0xff]  }
 0x200   :  { %v696_v42 = vpop.f32.mrf.mxu1  ;;  %v737_v43 = vpop.f32.mrf.mxu0 }
 0x201   :  { %v697_v44 = vadd.f32 %v696_v42, %v325_v38  ;;  %v738_v45 = vadd.f32 %v737_v43, %v333_v39  ;;  %v3815_v38 = vld [vmem:[#allocation8 + $0x3ec] ss:$16 sps:$4 sm:$0xff]   ;;  %v3810_v39 = vld [vmem:[#allocation8 + $0x1e8] ss:$16 sps:$4 sm:$0xff]  }
 0x202   :  { %v698_v46 = vpop.f32.mrf.mxu1  ;;  %v739_v47 = vpop.f32.mrf.mxu0  ;;  %v3821_v42 = vld [vmem:[#allocation8 + $0x3cc] ss:$16 sps:$4 sm:$0xff]   ;;  %v3816_v43 = vld [vmem:[#allocation8 + $0x1c8] ss:$16 sps:$4 sm:$0xff]  }
 0x203   :  { %v744_v48 = vmul.f32 0.01, %v697_v44  ;;  %v746_v49 = vmul.f32 0.01, %v738_v45  ;;  %v699_v50 = vadd.f32 %v698_v46, %v329_v40  ;;  %v740_v51 = vadd.f32 %v739_v47, %v337_v41  ;;  %v3813_v40 = vld [vmem:[#allocation8 + $0x3e8] ss:$16 sps:$4 sm:$0xff]  }
 0x204   :  { %v700_v52 = vpop.f32.mrf.mxu1  ;;  %v741_v53 = vpop.f32.mrf.mxu0  ;;  %v3818_v41 = vld [vmem:[#allocation8 + $0x1cc] ss:$16 sps:$4 sm:$0xff]   ;;  %v3822_v47 = vld [vmem:[#allocation8 + $0x1a8] ss:$16 sps:$4 sm:$0xff]  }
 0x205   :  { %v745_v54 = vmul.f32 0.01, %v699_v50  ;;  %v747_v55 = vmul.f32 0.01, %v740_v51  ;;  %v748_v56 = vmax.f32 %v697_v44, %v744_v48  ;;  %v750_v57 = vmax.f32 %v738_v45, %v746_v49  ;;  %v3819_v44 = vld [vmem:[#allocation8 + $0x3c8] ss:$16 sps:$4 sm:$0xff]  }
 0x206   :  { %v701_v58 = vpop.f32.mrf.mxu1  ;;  %v742_v59 = vpop.f32.mrf.mxu0  ;;  %v3824_v45 = vld [vmem:[#allocation8 + $0x1ac] ss:$16 sps:$4 sm:$0xff]   ;;  %v3825_v48 = vld [vmem:[#allocation8 + $0x3a8] ss:$16 sps:$4 sm:$0xff]  }
 0x207   :  { %v749_v60 = vmax.f32 %v699_v50, %v745_v54  ;;  %v751_v61 = vmax.f32 %v740_v51, %v747_v55  ;;  %v4452_v2 = vpack.c.bf16 %v748_v56, %v748_v56  ;;  %v4454_v3 = vpack.c.bf16 %v750_v57, %v750_v57  ;;  %v3827_v46 = vld [vmem:[#allocation8 + $0x3ac] ss:$16 sps:$4 sm:$0xff]   ;;  %v3828_v51 = vld [vmem:[#allocation8 + $0x188] ss:$16 sps:$4 sm:$0xff]  }
 0x208   :  { %v3830_v49 = vld [vmem:[#allocation8 + $0x18c] ss:$16 sps:$4 sm:$0xff]   ;;  %v3831_v52 = vld [vmem:[#allocation8 + $0x388] ss:$16 sps:$4 sm:$0xff]  }
 0x209   :  { %v753_v62 = vpack.c.bf16 %v749_v60, %v749_v60  ;;  %v755_v63 = vpack.c.bf16 %v751_v61, %v751_v61  ;;  %v3833_v50 = vld [vmem:[#allocation8 + $0x38c] ss:$16 sps:$4 sm:$0xff]   ;;  %v3834_v55 = vld [vmem:[#allocation8 + $0x168] ss:$16 sps:$4 sm:$0xff]  }
 0x20a   :  { %v3836_v53 = vld [vmem:[#allocation8 + $0x16c] ss:$16 sps:$4 sm:$0xff]   ;;  %v3837_v56 = vld [vmem:[#allocation8 + $0x368] ss:$16 sps:$4 sm:$0xff]  }
 0x20b   :  { %1578 = vmatprep.mubr.bf16.mxu1 %v753_v62  ;;  %1619 = vmatprep.mubr.bf16.mxu0 %v755_v63  ;;  %v3839_v54 = vld [vmem:[#allocation8 + $0x36c] ss:$16 sps:$4 sm:$0xff]   ;;  %v3840_v59 = vld [vmem:[#allocation8 + $0x148] ss:$16 sps:$4 sm:$0xff]  }
 0x20c   :  { %1579 = vmatmul.mubr.bf16.vlgmr.msra.gmra.mxu1 %v4452_v2  ;;  %1620 = vmatmul.mubr.bf16.vlgmr.msra.gmra.mxu0 %v4454_v3  ;;  %v3842_v57 = vld [vmem:[#allocation8 + $0x14c] ss:$16 sps:$4 sm:$0xff]   ;;  %v3843_v60 = vld [vmem:[#allocation8 + $0x348] ss:$16 sps:$4 sm:$0xff]  }
 0x20d   :  { %1629 = vmatpush1.bf16.msra.mxu1 %v3762_v0  ;;  %1670 = vmatpush1.bf16.msra.mxu0 %v3765_v1  ;;  %v3845_v58 = vld [vmem:[#allocation8 + $0x34c] ss:$16 sps:$4 sm:$0xff]   ;;  %v3849_v0 = vld [vmem:[#allocation8 + $0x328] ss:$16 sps:$4 sm:$0xff]  }
 0x20e   :  { %1660 = vmatprep.mubr.bf16.mxu1 %v753_v62  ;;  %1701 = vmatprep.mubr.bf16.mxu0 %v755_v63  ;;  %v3848_v61 = vld [vmem:[#allocation8 + $0x12c] ss:$16 sps:$4 sm:$0xff]   ;;  %v3846_v63 = vld [vmem:[#allocation8 + $0x128] ss:$16 sps:$4 sm:$0xff]  }
 0x20f   :  { %1630 = vmatprep.subr.bf16.mxu1 %v3770_v4  ;;  %1671 = vmatprep.subr.bf16.mxu0 %v3773_v5  ;;  %v3851_v62 = vld [vmem:[#allocation8 + $0x32c] ss:$16 sps:$4 sm:$0xff]   ;;  %v3852_v5 = vld [vmem:[#allocation8 + $0x108] ss:$16 sps:$4 sm:$0xff]  }
 0x210   :  { %v3854_v1 = vld [vmem:[#allocation8 + $0x10c] ss:$16 sps:$4 sm:$0xff]  }
 0x211   :  { %1631 = vmatpush1.bf16.msra.mxu1 %v3768_v6  ;;  %1672 = vmatpush1.bf16.msra.mxu0 %v3771_v7  ;;  %v3857_v4 = vld [vmem:[#allocation8 + $0x30c] ss:$16 sps:$4 sm:$0xff]   ;;  %v3855_v6 = vld [vmem:[#allocation8 + $0x308] ss:$16 sps:$4 sm:$0xff]  }
 0x212   :  { %1632 = vmatprep.subr.bf16.mxu1 %v3776_v8  ;;  %1673 = vmatprep.subr.bf16.mxu0 %v3779_v9  ;;  %v3860_v7 = vld [vmem:[#allocation11 + $0x74] ss:$8 sps:$4 sm:$0xff]   ;;  %v3858_v8 = vld [vmem:[#allocation11 + $0x70] ss:$8 sps:$4 sm:$0xff]   ;;  %v3863_v9 = vld [vmem:[#allocation11 + $0x64] ss:$8 sps:$4 sm:$0xff]  }
 0x215   :  { %1633 = vmatpush1.bf16.msra.mxu1 %v3774_v10  ;;  %1674 = vmatpush1.bf16.msra.mxu0 %v3777_v11  ;;  %v3861_v10 = vld [vmem:[#allocation11 + $0x60] ss:$8 sps:$4 sm:$0xff]   ;;  %v3866_v11 = vld [vmem:[#allocation11 + $0x54] ss:$8 sps:$4 sm:$0xff]  }
 0x216   :  { %1634 = vmatprep.subr.bf16.mxu1 %v3782_v12  ;;  %1675 = vmatprep.subr.bf16.mxu0 %v3785_v13  ;;  %v3864_v12 = vld [vmem:[#allocation11 + $0x50] ss:$8 sps:$4 sm:$0xff]   ;;  %v3869_v13 = vld [vmem:[#allocation11 + $0x44] ss:$8 sps:$4 sm:$0xff]  }
 0x219   :  { %1635 = vmatpush1.bf16.msra.mxu1 %v3780_v16  ;;  %1676 = vmatpush1.bf16.msra.mxu0 %v3783_v18  ;;  %v3867_v16 = vld [vmem:[#allocation11 + $0x40] ss:$8 sps:$4 sm:$0xff]   ;;  %v3872_v18 = vld [vmem:[#allocation11 + $0x34] ss:$8 sps:$4 sm:$0xff]  }
 0x21a   :  { %1636 = vmatprep.subr.bf16.mxu1 %v3788_v19  ;;  %1677 = vmatprep.subr.bf16.mxu0 %v3791_v20  ;;  %v3908_v19 = vld [vmem:[#allocation11 + $0x174] ss:$8 sps:$4 sm:$0xff]   ;;  %v3870_v20 = vld [vmem:[#allocation11 + $0x30] ss:$8 sps:$4 sm:$0xff]  }
 0x21d   :  { %1637 = vmatpush1.bf16.msra.mxu1 %v3786_v21  ;;  %1678 = vmatpush1.bf16.msra.mxu0 %v3789_v22  ;;  %v3906_v21 = vld [vmem:[#allocation11 + $0x170] ss:$8 sps:$4 sm:$0xff]   ;;  %v3909_v22 = vld [vmem:[#allocation11 + $0x160] ss:$8 sps:$4 sm:$0xff]  }
 0x21e   :  { %1638 = vmatprep.subr.bf16.mxu1 %v3794_v23  ;;  %1679 = vmatprep.subr.bf16.mxu0 %v3797_v24  ;;  %v3914_v23 = vld [vmem:[#allocation11 + $0x154] ss:$8 sps:$4 sm:$0xff]   ;;  %v3873_v24 = vld [vmem:[#allocation11 + $0x20] ss:$8 sps:$4 sm:$0xff]  }
 0x221   :  { %1639 = vmatpush1.bf16.msra.mxu1 %v3792_v25  ;;  %1680 = vmatpush1.bf16.msra.mxu0 %v3795_v26  ;;  %v3878_v25 = vld [vmem:[#allocation11 + $0x14] ss:$8 sps:$4 sm:$0xff]   ;;  %v3912_v26 = vld [vmem:[#allocation11 + $0x150] ss:$8 sps:$4 sm:$0xff]  }
 0x222   :  { %1640 = vmatprep.subr.bf16.mxu1 %v3800_v27  ;;  %1681 = vmatprep.subr.bf16.mxu0 %v3803_v28  ;;  %v3917_v27 = vld [vmem:[#allocation11 + $0x144] ss:$8 sps:$4 sm:$0xff]   ;;  %v3876_v28 = vld [vmem:[#allocation11 + $0x10] ss:$8 sps:$4 sm:$0xff]  }
 0x225   :  { %1641 = vmatpush1.bf16.msra.mxu1 %v3798_v29  ;;  %1682 = vmatpush1.bf16.msra.mxu0 %v3801_v30  ;;  %v3881_v29 = vld [vmem:[#allocation11 + $0x4] ss:$8 sps:$4 sm:$0xff]   ;;  %v3915_v30 = vld [vmem:[#allocation11 + $0x140] ss:$8 sps:$4 sm:$0xff]  }
 0x226   :  { %1642 = vmatprep.subr.bf16.mxu1 %v3806_v31  ;;  %1683 = vmatprep.subr.bf16.mxu0 %v3809_v32  ;;  %v3920_v31 = vld [vmem:[#allocation11 + $0x134] ss:$8 sps:$4 sm:$0xff]   ;;  %v3879_v32 = vld [vmem:[#allocation11] ss:$8 sps:$4 sm:$0xff]  }
 0x229   :  { %1643 = vmatpush1.bf16.msra.mxu1 %v3804_v33  ;;  %1684 = vmatpush1.bf16.msra.mxu0 %v3807_v34  ;;  %v3884_v33 = vld [vmem:[#allocation11 + $0xf4] ss:$8 sps:$4 sm:$0xff]   ;;  %v3918_v34 = vld [vmem:[#allocation11 + $0x130] ss:$8 sps:$4 sm:$0xff]  }
 0x22a   :  { %1644 = vmatprep.subr.bf16.mxu1 %v3812_v36  ;;  %1685 = vmatprep.subr.bf16.mxu0 %v3815_v38  ;;  %v3923_v36 = vld [vmem:[#allocation11 + $0x124] ss:$8 sps:$4 sm:$0xff]   ;;  %v3882_v38 = vld [vmem:[#allocation11 + $0xf0] ss:$8 sps:$4 sm:$0xff]  }
 0x22d   :  { %1645 = vmatpush2.bf16.msra.mxu1 %v3810_v39  ;;  %1686 = vmatpush2.bf16.msra.mxu0 %v3813_v40  ;;  %v3887_v39 = vld [vmem:[#allocation11 + $0xe4] ss:$8 sps:$4 sm:$0xff]   ;;  %v3921_v40 = vld [vmem:[#allocation11 + $0x120] ss:$8 sps:$4 sm:$0xff]  }
 0x22e   :  { %1646 = vmatprep.subr.bf16.mxu1 %v3818_v41  ;;  %1687 = vmatprep.subr.bf16.mxu0 %v3821_v42  ;;  %v3926_v41 = vld [vmem:[#allocation11 + $0x114] ss:$8 sps:$4 sm:$0xff]   ;;  %v3885_v42 = vld [vmem:[#allocation11 + $0xe0] ss:$8 sps:$4 sm:$0xff]  }
 0x231   :  { %1647 = vmatpush2.bf16.msra.mxu1 %v3816_v43  ;;  %1688 = vmatpush2.bf16.msra.mxu0 %v3819_v44  ;;  %v3890_v43 = vld [vmem:[#allocation11 + $0xd4] ss:$8 sps:$4 sm:$0xff]   ;;  %v3924_v44 = vld [vmem:[#allocation11 + $0x110] ss:$8 sps:$4 sm:$0xff]  }
 0x232   :  { %1648 = vmatprep.subr.bf16.mxu1 %v3824_v45  ;;  %1689 = vmatprep.subr.bf16.mxu0 %v3827_v46  ;;  %v3929_v45 = vld [vmem:[#allocation11 + $0x104] ss:$8 sps:$4 sm:$0xff]   ;;  %v3888_v46 = vld [vmem:[#allocation11 + $0xd0] ss:$8 sps:$4 sm:$0xff]  }
 0x235   :  { %1649 = vmatpush2.bf16.msra.mxu1 %v3822_v47  ;;  %1690 = vmatpush2.bf16.msra.mxu0 %v3825_v48  ;;  %v3893_v47 = vld [vmem:[#allocation11 + $0xc4] ss:$8 sps:$4 sm:$0xff]   ;;  %v3927_v48 = vld [vmem:[#allocation11 + $0x100] ss:$8 sps:$4 sm:$0xff]  }
 0x236   :  { %1650 = vmatprep.subr.bf16.mxu1 %v3830_v49  ;;  %1691 = vmatprep.subr.bf16.mxu0 %v3833_v50  ;;  %v3932_v49 = vld [vmem:[#allocation11 + $0x1f4] ss:$8 sps:$4 sm:$0xff]   ;;  %v3891_v50 = vld [vmem:[#allocation11 + $0xc0] ss:$8 sps:$4 sm:$0xff]  }
 0x239   :  { %1651 = vmatpush2.bf16.msra.mxu1 %v3828_v51  ;;  %1692 = vmatpush2.bf16.msra.mxu0 %v3831_v52  ;;  %v3896_v51 = vld [vmem:[#allocation11 + $0xb4] ss:$8 sps:$4 sm:$0xff]   ;;  %v3930_v52 = vld [vmem:[#allocation11 + $0x1f0] ss:$8 sps:$4 sm:$0xff]  }
 0x23a   :  { %1652 = vmatprep.subr.bf16.mxu1 %v3836_v53  ;;  %1693 = vmatprep.subr.bf16.mxu0 %v3839_v54  ;;  %v3935_v53 = vld [vmem:[#allocation11 + $0x1e4] ss:$8 sps:$4 sm:$0xff]   ;;  %v3894_v54 = vld [vmem:[#allocation11 + $0xb0] ss:$8 sps:$4 sm:$0xff]  }
 0x23d   :  { %1653 = vmatpush2.bf16.msra.mxu1 %v3834_v55  ;;  %1694 = vmatpush2.bf16.msra.mxu0 %v3837_v56  ;;  %v3899_v55 = vld [vmem:[#allocation11 + $0xa4] ss:$8 sps:$4 sm:$0xff]   ;;  %v3933_v56 = vld [vmem:[#allocation11 + $0x1e0] ss:$8 sps:$4 sm:$0xff]  }
 0x23e   :  { %1654 = vmatprep.subr.bf16.mxu1 %v3842_v57  ;;  %1695 = vmatprep.subr.bf16.mxu0 %v3845_v58  ;;  %v3938_v57 = vld [vmem:[#allocation11 + $0x1d4] ss:$8 sps:$4 sm:$0xff]   ;;  %v3897_v58 = vld [vmem:[#allocation11 + $0xa0] ss:$8 sps:$4 sm:$0xff]  }
 0x241   :  { %1655 = vmatpush2.bf16.msra.mxu1 %v3840_v59  ;;  %1696 = vmatpush2.bf16.msra.mxu0 %v3843_v60  ;;  %v3902_v59 = vld [vmem:[#allocation11 + $0x94] ss:$8 sps:$4 sm:$0xff]   ;;  %v3936_v60 = vld [vmem:[#allocation11 + $0x1d0] ss:$8 sps:$4 sm:$0xff]  }
 0x242   :  { %1656 = vmatprep.subr.bf16.mxu1 %v3848_v61  ;;  %1697 = vmatprep.subr.bf16.mxu0 %v3851_v62  ;;  %v3941_v61 = vld [vmem:[#allocation11 + $0x1c4] ss:$8 sps:$4 sm:$0xff]   ;;  %v3900_v62 = vld [vmem:[#allocation11 + $0x90] ss:$8 sps:$4 sm:$0xff]  }
 0x245   :  { %1657 = vmatpush2.bf16.msra.mxu1 %v3846_v63  ;;  %1698 = vmatpush2.bf16.msra.mxu0 %v3849_v0  ;;  %v3905_v63 = vld [vmem:[#allocation11 + $0x84] ss:$8 sps:$4 sm:$0xff]   ;;  %v3939_v0 = vld [vmem:[#allocation11 + $0x1c0] ss:$8 sps:$4 sm:$0xff]  }
 0x246   :  { %1658 = vmatprep.subr.bf16.mxu1 %v3854_v1  ;;  %1699 = vmatprep.subr.bf16.mxu0 %v3857_v4  ;;  %v3944_v1 = vld [vmem:[#allocation11 + $0x1b4] ss:$8 sps:$4 sm:$0xff]   ;;  %v3903_v4 = vld [vmem:[#allocation11 + $0x80] ss:$8 sps:$4 sm:$0xff]  }
 0x249   :  { %1659 = vmatpush2.bf16.msra.mxu1 %v3852_v5  ;;  %1700 = vmatpush2.bf16.msra.mxu0 %v3855_v6  ;;  %v3942_v5 = vld [vmem:[#allocation11 + $0x1b0] ss:$8 sps:$4 sm:$0xff]   ;;  %v3947_v6 = vld [vmem:[#allocation11 + $0x1a4] ss:$8 sps:$4 sm:$0xff]  }
 0x24a   :  { %2118 = vmatprep.subr.bf16.mxu1 %v3860_v7  ;;  %2159 = vmatprep.subr.bf16.mxu0 %v3908_v19  ;;  %v3945_v7 = vld [vmem:[#allocation11 + $0x1a0] ss:$8 sps:$4 sm:$0xff]  }
 0x24c   :  { %1661 = vmatmul.mubr.bf16.vlgmr.msra.gmra.mxu1 %v4452_v2  ;;  %1702 = vmatmul.mubr.bf16.vlgmr.msra.gmra.mxu0 %v4454_v3  ;;  %v3875_v2 = vld [vmem:[#allocation11 + $0x24] ss:$8 sps:$4 sm:$0xff]  }
 0x24d   :  { %2119 = vmatpush1.bf16.msra.mxu1 %v3858_v8  ;;  %v3911_v3 = vld [vmem:[#allocation11 + $0x164] ss:$8 sps:$4 sm:$0xff]   ;;  %2160 = vmatpush1.bf16.msra.mxu0 %v3906_v21  ;;  %v3950_v8 = vld [vmem:[#allocation11 + $0x194] ss:$8 sps:$4 sm:$0xff]  }
 0x24e   :  { %2120 = vmatprep.subr.bf16.mxu1 %v3863_v9  ;;  %2161 = vmatprep.subr.bf16.mxu0 %v3911_v3  ;;  %v3948_v9 = vld [vmem:[#allocation11 + $0x190] ss:$8 sps:$4 sm:$0xff]  }
 0x251   :  { %2121 = vmatpush1.bf16.msra.mxu1 %v3861_v10  ;;  %2162 = vmatpush1.bf16.msra.mxu0 %v3909_v22  ;;  %v3953_v10 = vld [vmem:[#allocation11 + $0x184] ss:$8 sps:$4 sm:$0xff]  }
 0x252   :  { %2122 = vmatprep.subr.bf16.mxu1 %v3866_v11  ;;  %2163 = vmatprep.subr.bf16.mxu0 %v3914_v23  ;;  %v3951_v11 = vld [vmem:[#allocation11 + $0x180] ss:$8 sps:$4 sm:$0xff]  }
 0x255   :  { %2123 = vmatpush1.bf16.msra.mxu1 %v3864_v12  ;;  %2164 = vmatpush1.bf16.msra.mxu0 %v3912_v26  ;;  %v884_v12 = vld [vmem:[#allocation10] sm:$0xf] }
 0x256   :  { %2124 = vmatprep.subr.bf16.mxu1 %v3869_v13  ;;  %2165 = vmatprep.subr.bf16.mxu0 %v3917_v27  ;;  %v889_v13 = vrot.slane %v884_v12, %v4429_v15 }
 0x259   :  { %2125 = vmatpush1.bf16.msra.mxu1 %v3867_v16  ;;  %2166 = vmatpush1.bf16.msra.mxu0 %v3915_v30  ;;  %v893_v16 = vrot.slane %v884_v12, %v4435_v17 }
 0x25a   :  { %2126 = vmatprep.subr.bf16.mxu1 %v3872_v18  ;;  %2167 = vmatprep.subr.bf16.mxu0 %v3920_v31 }
 0x25d   :  { %2127 = vmatpush1.bf16.msra.mxu1 %v3870_v20  ;;  %2168 = vmatpush1.bf16.msra.mxu0 %v3918_v34  ;;  %v897_v34 = vrot.slane %v884_v12, %v4440_v35 }
 0x25e   :  { %2128 = vmatprep.subr.bf16.mxu1 %v3875_v2  ;;  %2169 = vmatprep.subr.bf16.mxu0 %v3923_v36  ;;  %v901_v36 = vrot.slane %v884_v12, %v4446_v37  ;;  %v3978_v12 = vld [vmem:[#allocation14 + $0xa8] ss:$28 sps:$4 sm:$0xff]  }
 0x261   :  { %2129 = vmatpush1.bf16.msra.mxu1 %v3873_v24  ;;  %2170 = vmatpush1.bf16.msra.mxu0 %v3921_v40 }
 0x262   :  { %2130 = vmatprep.subr.bf16.mxu1 %v3878_v25  ;;  %2171 = vmatprep.subr.bf16.mxu0 %v3926_v41 }
 0x265   :  { %2131 = vmatpush1.bf16.msra.mxu1 %v3876_v28  ;;  %2172 = vmatpush1.bf16.msra.mxu0 %v3924_v44 }
 0x266   :  { %2132 = vmatprep.subr.bf16.mxu1 %v3881_v29  ;;  %2173 = vmatprep.subr.bf16.mxu0 %v3929_v45 }
 0x269   :  { %2133 = vmatpush1.bf16.msra.mxu1 %v3879_v32  ;;  %2174 = vmatpush1.bf16.msra.mxu0 %v3927_v48 }
 0x26a   :  { %2134 = vmatprep.subr.bf16.mxu1 %v3884_v33  ;;  %2175 = vmatprep.subr.bf16.mxu0 %v3932_v49 }
 0x26d   :  { %2135 = vmatpush2.bf16.msra.mxu1 %v3882_v38  ;;  %2176 = vmatpush2.bf16.msra.mxu0 %v3930_v52 }
 0x26e   :  { %2136 = vmatprep.subr.bf16.mxu1 %v3887_v39  ;;  %2177 = vmatprep.subr.bf16.mxu0 %v3935_v53 }
 0x271   :  { %2137 = vmatpush2.bf16.msra.mxu1 %v3885_v42  ;;  %2178 = vmatpush2.bf16.msra.mxu0 %v3933_v56  ;;  %v3954_v56 = vld [vmem:[#allocation14 + $0x188] ss:$28 sps:$4 sm:$0xff]  }
 0x272   :  { %2138 = vmatprep.subr.bf16.mxu1 %v3890_v43  ;;  %2179 = vmatprep.subr.bf16.mxu0 %v3938_v57  ;;  %v3956_v57 = vld [vmem:[#allocation14 + $0x18c] ss:$28 sps:$4 sm:$0xff]  }
 0x275   :  { %2139 = vmatpush2.bf16.msra.mxu1 %v3888_v46  ;;  %2180 = vmatpush2.bf16.msra.mxu0 %v3936_v60  ;;  %v3962_v60 = vld [vmem:[#allocation14 + $0x154] ss:$28 sps:$4 sm:$0xff]  }
 0x276   :  { %2140 = vmatprep.subr.bf16.mxu1 %v3893_v47  ;;  %2181 = vmatprep.subr.bf16.mxu0 %v3941_v61  ;;  %v3965_v61 = vld [vmem:[#allocation14 + $0x15c] ss:$28 sps:$4 sm:$0xff]  }
 0x279   :  { %2141 = vmatpush2.bf16.msra.mxu1 %v3891_v50  ;;  %2182 = vmatpush2.bf16.msra.mxu0 %v3939_v0  ;;  %v3968_v0 = vld [vmem:[#allocation14 + $0x11c] ss:$28 sps:$4 sm:$0xff]  }
 0x27a   :  { %2142 = vmatprep.subr.bf16.mxu1 %v3896_v51  ;;  %2183 = vmatprep.subr.bf16.mxu0 %v3944_v1  ;;  %v3971_v1 = vld [vmem:[#allocation14 + $0x124] ss:$28 sps:$4 sm:$0xff]  }
 0x27d   :  { %2143 = vmatpush2.bf16.msra.mxu1 %v3894_v54  ;;  %2184 = vmatpush2.bf16.msra.mxu0 %v3942_v5  ;;  %v3969_v5 = vld [vmem:[#allocation14 + $0x120] ss:$28 sps:$4 sm:$0xff]  }
 0x27e   :  { %2144 = vmatprep.subr.bf16.mxu1 %v3899_v55  ;;  %2185 = vmatprep.subr.bf16.mxu0 %v3947_v6  ;;  %v3974_v6 = vld [vmem:[#allocation14 + $0xe4] ss:$28 sps:$4 sm:$0xff]  }
 0x281   :  { %2145 = vmatpush2.bf16.msra.mxu1 %v3897_v58  ;;  %2186 = vmatpush2.bf16.msra.mxu0 %v3945_v7  ;;  %v3957_v58 = vld [vmem:[#allocation14 + $0x190] ss:$28 sps:$4 sm:$0xff]  }
 0x282   :  { %2146 = vmatprep.subr.bf16.mxu1 %v3902_v59  ;;  %2187 = vmatprep.subr.bf16.mxu0 %v3950_v8  ;;  %v3959_v59 = vld [vmem:[#allocation14 + $0x194] ss:$28 sps:$4 sm:$0xff]   ;;  %v3977_v7 = vld [vmem:[#allocation14 + $0xec] ss:$28 sps:$4 sm:$0xff]   ;;  %v3972_v8 = vld [vmem:[#allocation14 + $0xe0] ss:$28 sps:$4 sm:$0xff]  }
 0x285   :  { %2147 = vmatpush2.bf16.msra.mxu1 %v3900_v62  ;;  %2188 = vmatpush2.bf16.msra.mxu0 %v3948_v9  ;;  %v3960_v62 = vld [vmem:[#allocation14 + $0x150] ss:$28 sps:$4 sm:$0xff]   ;;  %v3975_v9 = vld [vmem:[#allocation14 + $0xe8] ss:$28 sps:$4 sm:$0xff]  }
 0x286   :  { %2148 = vmatprep.subr.bf16.mxu1 %v3905_v63  ;;  %2189 = vmatprep.subr.bf16.mxu0 %v3953_v10  ;;  %v3963_v63 = vld [vmem:[#allocation14 + $0x158] ss:$28 sps:$4 sm:$0xff]   ;;  %v3980_v10 = vld [vmem:[#allocation14 + $0xac] ss:$28 sps:$4 sm:$0xff]  }
 0x289   :  { %2149 = vmatpush2.bf16.msra.mxu1 %v3903_v4  ;;  %2190 = vmatpush2.bf16.msra.mxu0 %v3951_v11  ;;  %v3966_v4 = vld [vmem:[#allocation14 + $0x118] ss:$28 sps:$4 sm:$0xff]  }
 0x28a   :  { %2947 = vmatprep.subr.bf16.mxu1 %v3956_v57  ;;  %2988 = vmatprep.subr.bf16.mxu0 %v3959_v59  ;;  %v3983_v11 = vld [vmem:[#allocation14 + $0xb4] ss:$28 sps:$4 sm:$0xff]   ;;  %v4046_v57 = vld [vmem:[#allocation14 + $0x1c4] ss:$28 sps:$4 sm:$0xff]  }
 0x28b   :  { %v4044_v59 = vld [vmem:[#allocation14 + $0x1c0] ss:$28 sps:$4 sm:$0xff]  }
 0x2cc   :  { %v1580_v18 = vpop.f32.mrf.mxu1  ;;  %v1621_v19 = vpop.f32.mrf.mxu0 }
 0x2cd   :  { %v1581_v20 = vadd.f32 %v1580_v18, %v889_v13  ;;  %v3981_v13 = vld [vmem:[#allocation14 + $0xb0] ss:$28 sps:$4 sm:$0xff]   ;;  %v3989_v18 = vld [vmem:[#allocation14 + $0x7c] ss:$28 sps:$4 sm:$0xff]  }
 0x2ce   :  { %v1582_v21 = vpop.f32.mrf.mxu1  ;;  %v1623_v2 = vpop.f32.mrf.mxu0 }
 0x2cf   :  { %v1622_v3 = vadd.f32 %v1621_v19, %v1581_v20  ;;  %v1583_v22 = vadd.f32 %v1582_v21, %v893_v16  ;;  %v3986_v16 = vld [vmem:[#allocation14 + $0x74] ss:$28 sps:$4 sm:$0xff]   ;;  %v3992_v21 = vld [vmem:[#allocation14 + $0x3c] ss:$28 sps:$4 sm:$0xff]  }
 0x2d0   :  { %v1584_v23 = vpop.f32.mrf.mxu1  ;;  %v1625_v24 = vpop.f32.mrf.mxu0  ;;  %v3984_v19 = vld [vmem:[#allocation14 + $0x70] ss:$28 sps:$4 sm:$0xff]   ;;  %v3987_v20 = vld [vmem:[#allocation14 + $0x78] ss:$28 sps:$4 sm:$0xff]  }
 0x2d1   :  { %v1710_v25 = vmul.f32 0.01, %v1622_v3  ;;  %v1624_v26 = vadd.f32 %v1623_v2, %v1583_v22  ;;  %v3995_v2 = vld [vmem:[#allocation14 + $0x44] ss:$28 sps:$4 sm:$0xff]   ;;  %v4001_v24 = vld [vmem:[#allocation14 + $0xc] ss:$28 sps:$4 sm:$0xff]  }
 0x2d2   :  { %v1585_v27 = vpop.f32.mrf.mxu1  ;;  %v1626_v28 = vpop.f32.mrf.mxu0  ;;  %v3993_v22 = vld [vmem:[#allocation14 + $0x40] ss:$28 sps:$4 sm:$0xff]  }
 0x2d3   :  { %v1711_v29 = vmul.f32 0.01, %v1624_v26  ;;  %v1714_v30 = vmax.f32 %v1622_v3, %v1710_v25  ;;  %v3990_v3 = vld [vmem:[#allocation14 + $0x38] ss:$28 sps:$4 sm:$0xff]   ;;  %v3998_v23 = vld [vmem:[#allocation14 + $0x4] ss:$28 sps:$4 sm:$0xff]  }
 0x2d4   :  { %v3996_v25 = vld [vmem:[#allocation14] ss:$28 sps:$4 sm:$0xff]   ;;  %v4004_v27 = vld [vmem:[#allocation14 + $0x34c] ss:$28 sps:$4 sm:$0xff]   ;;  %v4007_v28 = vld [vmem:[#allocation14 + $0x354] ss:$28 sps:$4 sm:$0xff]  }
 0x2d5   :  { %v1715_v31 = vmax.f32 %v1624_v26, %v1711_v29  ;;  %v1718_v33 = vpack.c.bf16 %v1714_v30, %v1714_v30  ;;  %v3999_v26 = vld [vmem:[#allocation14 + $0x8] ss:$28 sps:$4 sm:$0xff]   ;;  %v4005_v30 = vld [vmem:[#allocation14 + $0x350] ss:$28 sps:$4 sm:$0xff]  }
 0x2d6   :  { %v4002_v29 = vld [vmem:[#allocation14 + $0x348] ss:$28 sps:$4 sm:$0xff]  }
 0x2d7   :  { %v1719_v32 = vpack.c.bf16 %v1715_v31, %v1715_v31  ;;  %v4010_v31 = vld [vmem:[#allocation14 + $0x314] ss:$28 sps:$4 sm:$0xff]  }
 0x2d9   :  { %2150 = vmatprep.mubr.bf16.mxu1 %v1719_v32  ;;  %v4013_v32 = vld [vmem:[#allocation14 + $0x31c] ss:$28 sps:$4 sm:$0xff]  }
 0x2da   :  { %2151 = vmatmul.mubr.bf16.vlgmr.msra.gmra.mxu1 %v1718_v33  ;;  %v4008_v33 = vld [vmem:[#allocation14 + $0x310] ss:$28 sps:$4 sm:$0xff]  }
 0x2db   :  { %2948 = vmatpush1.bf16.msra.mxu1 %v3954_v56  ;;  %v4041_v56 = vld [vmem:[#allocation14 + $0x200] ss:$28 sps:$4 sm:$0xff]  }
 0x2dc   :  { %2949 = vmatprep.subr.bf16.mxu1 %v3962_v60  ;;  %v4047_v60 = vld [vmem:[#allocation14 + $0x1c8] ss:$28 sps:$4 sm:$0xff]  }
 0x2df   :  { %2950 = vmatpush1.bf16.msra.mxu1 %v3960_v62  ;;  %v4053_v62 = vld [vmem:[#allocation14 + $0x360] ss:$28 sps:$4 sm:$0xff]  }
 0x2e0   :  { %2951 = vmatprep.subr.bf16.mxu1 %v3968_v0 }
 0x2e3   :  { %2952 = vmatpush1.bf16.msra.mxu1 %v3966_v4 }
 0x2e4   :  { %2953 = vmatprep.subr.bf16.mxu1 %v3974_v6 }
 0x2e7   :  { %2954 = vmatpush1.bf16.msra.mxu1 %v3972_v8 }
 0x2e8   :  { %2955 = vmatprep.subr.bf16.mxu1 %v3980_v10 }
 0x2eb   :  { %2956 = vmatpush1.bf16.msra.mxu1 %v3978_v12 }
 0x2ec   :  { %2957 = vmatprep.subr.bf16.mxu1 %v3986_v16 }
 0x2ef   :  { %2958 = vmatpush1.bf16.msra.mxu1 %v3984_v19 }
 0x2f0   :  { %2959 = vmatprep.subr.bf16.mxu1 %v3992_v21 }
 0x2f3   :  { %2960 = vmatpush1.bf16.msra.mxu1 %v3990_v3 }
 0x2f4   :  { %2961 = vmatprep.subr.bf16.mxu1 %v3998_v23  ;;  %v4054_v23 = vld [vmem:[#allocation14 + $0x1a0] ss:$28 sps:$4 sm:$0xff]  }
 0x2f7   :  { %2962 = vmatpush1.bf16.msra.mxu1 %v3996_v25  ;;  %v4057_v25 = vld [vmem:[#allocation14 + $0x164] ss:$28 sps:$4 sm:$0xff]  }
 0x2f8   :  { %2963 = vmatprep.subr.bf16.mxu1 %v4004_v27  ;;  %v4055_v27 = vld [vmem:[#allocation14 + $0x160] ss:$28 sps:$4 sm:$0xff]  }
 0x2fb   :  { %2964 = vmatpush2.bf16.msra.mxu1 %v4002_v29  ;;  %v4062_v29 = vld [vmem:[#allocation14 + $0x12c] ss:$28 sps:$4 sm:$0xff]  }
 0x2fc   :  { %2965 = vmatprep.subr.bf16.mxu1 %v4010_v31  ;;  %v4060_v31 = vld [vmem:[#allocation14 + $0x128] ss:$28 sps:$4 sm:$0xff]  }
 0x2ff   :  { %2966 = vmatpush2.bf16.msra.mxu1 %v4008_v33  ;;  %v4067_v33 = vld [vmem:[#allocation14 + $0xf4] ss:$28 sps:$4 sm:$0xff]  }
 0x30c   :  { %v1662_v38 = vpop.f32.mrf.mxu1  ;;  %v1703_v39 = vpop.f32.mrf.mxu0 }
 0x30d   :  { %v1663_v40 = vadd.f32 %v1662_v38, %v897_v34  ;;  %v4011_v34 = vld [vmem:[#allocation14 + $0x318] ss:$28 sps:$4 sm:$0xff]   ;;  %v4019_v38 = vld [vmem:[#allocation14 + $0x2e4] ss:$28 sps:$4 sm:$0xff]  }
 0x30e   :  { %v1664_v41 = vpop.f32.mrf.mxu1  ;;  %v1705_v42 = vpop.f32.mrf.mxu0 }
 0x30f   :  { %v1704_v43 = vadd.f32 %v1703_v39, %v1663_v40  ;;  %v1665_v44 = vadd.f32 %v1664_v41, %v901_v36  ;;  %v4016_v36 = vld [vmem:[#allocation14 + $0x2dc] ss:$28 sps:$4 sm:$0xff]   ;;  %v4022_v41 = vld [vmem:[#allocation14 + $0x2a4] ss:$28 sps:$4 sm:$0xff]  }
 0x310   :  { %v1666_v45 = vpop.f32.mrf.mxu1  ;;  %v1707_v46 = vpop.f32.mrf.mxu0  ;;  %v4014_v39 = vld [vmem:[#allocation14 + $0x2d8] ss:$28 sps:$4 sm:$0xff]   ;;  %2967 = vmatprep.subr.bf16.mxu1 %v4016_v36  ;;  %v4017_v40 = vld [vmem:[#allocation14 + $0x2e0] ss:$28 sps:$4 sm:$0xff]   ;;  %v4065_v36 = vld [vmem:[#allocation14 + $0xf0] ss:$28 sps:$4 sm:$0xff]  }
 0x311   :  { %v1712_v47 = vmul.f32 0.01, %v1704_v43  ;;  %v1706_v48 = vadd.f32 %v1705_v42, %v1665_v44  ;;  %v4025_v42 = vld [vmem:[#allocation14 + $0x2ac] ss:$28 sps:$4 sm:$0xff]   ;;  %2968 = vmatpush2.bf16.msra.mxu1 %v4014_v39  ;;  %v4031_v46 = vld [vmem:[#allocation14 + $0x274] ss:$28 sps:$4 sm:$0xff]  }
 0x312   :  { %v1667_v49 = vpop.f32.mrf.mxu1  ;;  %v1708_v50 = vpop.f32.mrf.mxu0  ;;  %2969 = vmatprep.subr.bf16.mxu1 %v4022_v41  ;;  %v4023_v44 = vld [vmem:[#allocation14 + $0x2a8] ss:$28 sps:$4 sm:$0xff]   ;;  %v4072_v39 = vld [vmem:[#allocation14 + $0xbc] ss:$28 sps:$4 sm:$0xff]  }
 0x313   :  { %v1713_v51 = vmul.f32 0.01, %v1706_v48  ;;  %v1716_v52 = vmax.f32 %v1704_v43, %v1712_v47  ;;  %v4020_v43 = vld [vmem:[#allocation14 + $0x2a0] ss:$28 sps:$4 sm:$0xff]   ;;  %v4028_v45 = vld [vmem:[#allocation14 + $0x26c] ss:$28 sps:$4 sm:$0xff]  }
 0x314   :  { %v4026_v47 = vld [vmem:[#allocation14 + $0x268] ss:$28 sps:$4 sm:$0xff]   ;;  %v4034_v49 = vld [vmem:[#allocation14 + $0x234] ss:$28 sps:$4 sm:$0xff]   ;;  %v4037_v50 = vld [vmem:[#allocation14 + $0x23c] ss:$28 sps:$4 sm:$0xff]  }
 0x315   :  { %v1717_v53 = vmax.f32 %v1706_v48, %v1713_v51  ;;  %v1720_v55 = vpack.c.bf16 %v1716_v52, %v1716_v52  ;;  %2970 = vmatpush2.bf16.msra.mxu1 %v4020_v43  ;;  %v4029_v48 = vld [vmem:[#allocation14 + $0x270] ss:$28 sps:$4 sm:$0xff]   ;;  %v4035_v52 = vld [vmem:[#allocation14 + $0x238] ss:$28 sps:$4 sm:$0xff]   ;;  %v4077_v43 = vld [vmem:[#allocation14 + $0x84] ss:$28 sps:$4 sm:$0xff]  }
 0x316   :  { %2971 = vmatprep.subr.bf16.mxu1 %v4028_v45  ;;  %v4032_v51 = vld [vmem:[#allocation14 + $0x230] ss:$28 sps:$4 sm:$0xff]   ;;  %v4070_v41 = vld [vmem:[#allocation14 + $0xb8] ss:$28 sps:$4 sm:$0xff]   ;;  %v4075_v45 = vld [vmem:[#allocation14 + $0x80] ss:$28 sps:$4 sm:$0xff]  }
 0x317   :  { %v1721_v54 = vpack.c.bf16 %v1717_v53, %v1717_v53  ;;  %v4040_v53 = vld [vmem:[#allocation14 + $0x1fc] ss:$28 sps:$4 sm:$0xff]  }
 0x319   :  { %2191 = vmatprep.mubr.bf16.mxu0 %v1721_v54  ;;  %2972 = vmatpush2.bf16.msra.mxu1 %v4026_v47  ;;  %v4043_v54 = vld [vmem:[#allocation14 + $0x204] ss:$28 sps:$4 sm:$0xff]   ;;  %v4082_v47 = vld [vmem:[#allocation14 + $0x4c] ss:$28 sps:$4 sm:$0xff]  }
 0x31a   :  { %2192 = vmatmul.mubr.bf16.vlgmr.msra.gmra.mxu0 %v1720_v55  ;;  %2973 = vmatprep.subr.bf16.mxu1 %v4034_v49  ;;  %v4038_v55 = vld [vmem:[#allocation14 + $0x1f8] ss:$28 sps:$4 sm:$0xff]   ;;  %v4080_v49 = vld [vmem:[#allocation14 + $0x48] ss:$28 sps:$4 sm:$0xff]  }
 0x31b   :  { %2989 = vmatpush1.bf16.msra.mxu0 %v3957_v58  ;;  %v4049_v58 = vld [vmem:[#allocation14 + $0x1cc] ss:$28 sps:$4 sm:$0xff]  }
 0x31c   :  { %2990 = vmatprep.subr.bf16.mxu0 %v3965_v61  ;;  %v4052_v61 = vld [vmem:[#allocation14 + $0x19c] ss:$28 sps:$4 sm:$0xff]  }
 0x31d   :  { %2974 = vmatpush2.bf16.msra.mxu1 %v4032_v51  ;;  %v4087_v51 = vld [vmem:[#allocation14 + $0x14] ss:$28 sps:$4 sm:$0xff]  }
 0x31e   :  { %2975 = vmatprep.subr.bf16.mxu1 %v4040_v53  ;;  %v4085_v53 = vld [vmem:[#allocation14 + $0x10] ss:$28 sps:$4 sm:$0xff]  }
 0x31f   :  { %2991 = vmatpush1.bf16.msra.mxu0 %v3963_v63 }
 0x320   :  { %2992 = vmatprep.subr.bf16.mxu0 %v3971_v1 }
 0x321   :  { %2976 = vmatpush2.bf16.msra.mxu1 %v4038_v55  ;;  %v4092_v55 = vld [vmem:[#allocation14 + $0x35c] ss:$28 sps:$4 sm:$0xff]  }
 0x322   :  { %2977 = vmatprep.subr.bf16.mxu1 %v4046_v57  ;;  %v4095_v57 = vld [vmem:[#allocation14 + $0x324] ss:$28 sps:$4 sm:$0xff]  }
 0x323   :  { %2993 = vmatpush1.bf16.msra.mxu0 %v3969_v5  ;;  %v1786_v5 = vld [vmem:[#allocation13] sm:$0x3] }
 0x324   :  { %2994 = vmatprep.subr.bf16.mxu0 %v3977_v7  ;;  %v1791_v6 = vrot.slane %v1786_v5, %v4429_v15  ;;  %v1795_v7 = vrot.slane %v1786_v5, %v4435_v17  ;;  %v4110_v5 = vld [vmem:[#allocation14 + $0x20c] ss:$28 sps:$4 sm:$0xff]  }
 0x325   :  { %2978 = vmatpush2.bf16.msra.mxu1 %v4044_v59  ;;  %v4098_v59 = vld [vmem:[#allocation14 + $0x2ec] ss:$28 sps:$4 sm:$0xff]  }
 0x326   :  { %3029 = vmatprep.subr.bf16.mxu1 %v4052_v61  ;;  %v4101_v61 = vld [vmem:[#allocation14 + $0x2b4] ss:$28 sps:$4 sm:$0xff]  }
 0x327   :  { %2995 = vmatpush1.bf16.msra.mxu0 %v3975_v9 }
 0x328   :  { %2996 = vmatprep.subr.bf16.mxu0 %v3983_v11 }
 0x32b   :  { %2997 = vmatpush1.bf16.msra.mxu0 %v3981_v13 }
 0x32c   :  { %2998 = vmatprep.subr.bf16.mxu0 %v3989_v18 }
 0x32f   :  { %2999 = vmatpush1.bf16.msra.mxu0 %v3987_v20 }
 0x330   :  { %3000 = vmatprep.subr.bf16.mxu0 %v3995_v2 }
 0x333   :  { %3001 = vmatpush1.bf16.msra.mxu0 %v3993_v22  ;;  %v4050_v22 = vld [vmem:[#allocation14 + $0x198] ss:$28 sps:$4 sm:$0xff]  }
 0x334   :  { %3002 = vmatprep.subr.bf16.mxu0 %v4001_v24 }
 0x337   :  { %3003 = vmatpush1.bf16.msra.mxu0 %v3999_v26  ;;  %v4058_v26 = vld [vmem:[#allocation14 + $0x328] ss:$28 sps:$4 sm:$0xff]  }
 0x338   :  { %3004 = vmatprep.subr.bf16.mxu0 %v4007_v28  ;;  %v4059_v28 = vld [vmem:[#allocation14 + $0x168] ss:$28 sps:$4 sm:$0xff]  }
 0x33b   :  { %3005 = vmatpush2.bf16.msra.mxu0 %v4005_v30  ;;  %v4063_v30 = vld [vmem:[#allocation14 + $0x2f0] ss:$28 sps:$4 sm:$0xff]  }
 0x33c   :  { %3006 = vmatprep.subr.bf16.mxu0 %v4013_v32  ;;  %v4064_v32 = vld [vmem:[#allocation14 + $0x130] ss:$28 sps:$4 sm:$0xff]  }
 0x33f   :  { %3007 = vmatpush2.bf16.msra.mxu0 %v4011_v34  ;;  %v4068_v34 = vld [vmem:[#allocation14 + $0x2b8] ss:$28 sps:$4 sm:$0xff]  }
 0x340   :  { %3008 = vmatprep.subr.bf16.mxu0 %v4019_v38  ;;  %v4069_v38 = vld [vmem:[#allocation14 + $0xf8] ss:$28 sps:$4 sm:$0xff]  }
 0x343   :  { %3009 = vmatpush2.bf16.msra.mxu0 %v4017_v40  ;;  %v4073_v40 = vld [vmem:[#allocation14 + $0x280] ss:$28 sps:$4 sm:$0xff]  }
 0x344   :  { %3010 = vmatprep.subr.bf16.mxu0 %v4025_v42  ;;  %v4074_v42 = vld [vmem:[#allocation14 + $0xc0] ss:$28 sps:$4 sm:$0xff]  }
 0x347   :  { %3011 = vmatpush2.bf16.msra.mxu0 %v4023_v44  ;;  %v4078_v44 = vld [vmem:[#allocation14 + $0x248] ss:$28 sps:$4 sm:$0xff]  }
 0x348   :  { %3012 = vmatprep.subr.bf16.mxu0 %v4031_v46  ;;  %v4079_v46 = vld [vmem:[#allocation14 + $0x88] ss:$28 sps:$4 sm:$0xff]  }
 0x34b   :  { %3013 = vmatpush2.bf16.msra.mxu0 %v4029_v48  ;;  %v4083_v48 = vld [vmem:[#allocation14 + $0x210] ss:$28 sps:$4 sm:$0xff]  }
 0x34c   :  { %3014 = vmatprep.subr.bf16.mxu0 %v4037_v50  ;;  %v4084_v50 = vld [vmem:[#allocation14 + $0x50] ss:$28 sps:$4 sm:$0xff]  }
 0x34f   :  { %3015 = vmatpush2.bf16.msra.mxu0 %v4035_v52  ;;  %v4088_v52 = vld [vmem:[#allocation14 + $0x1d8] ss:$28 sps:$4 sm:$0xff]  }
 0x350   :  { %3016 = vmatprep.subr.bf16.mxu0 %v4043_v54  ;;  %v4089_v54 = vld [vmem:[#allocation14 + $0x18] ss:$28 sps:$4 sm:$0xff]  }
 0x353   :  { %3017 = vmatpush2.bf16.msra.mxu0 %v4041_v56  ;;  %v4090_v56 = vld [vmem:[#allocation14 + $0x358] ss:$28 sps:$4 sm:$0xff]  }
 0x354   :  { %3018 = vmatprep.subr.bf16.mxu0 %v4049_v58  ;;  %v4093_v58 = vld [vmem:[#allocation14 + $0x320] ss:$28 sps:$4 sm:$0xff]  }
 0x357   :  { %3019 = vmatpush2.bf16.msra.mxu0 %v4047_v60  ;;  %v4096_v60 = vld [vmem:[#allocation14 + $0x2e8] ss:$28 sps:$4 sm:$0xff]  }
 0x358   :  { %3520 = vmatprep.subr.bf16.mxu0 %v4053_v62  ;;  %v4099_v62 = vld [vmem:[#allocation14 + $0x2b0] ss:$28 sps:$4 sm:$0xff]  }
 0x39a   :  { %v2152_v63 = vpop.f32.mrf.mxu1 }
 0x39b   :  { %v2153_v8 = vadd.f32 %v2152_v63, %v1791_v6  ;;  %v4104_v63 = vld [vmem:[#allocation14 + $0x27c] ss:$28 sps:$4 sm:$0xff]   ;;  %v4108_v6 = vld [vmem:[#allocation14 + $0x208] ss:$28 sps:$4 sm:$0xff]  }
 0x39c   :  { %v2154_v0 = vpop.f32.mrf.mxu1 }
 0x39d   :  { %v2155_v10 = vadd.f32 %v2154_v0, %v1795_v7  ;;  %v4102_v0 = vld [vmem:[#allocation14 + $0x278] ss:$28 sps:$4 sm:$0xff]  }
 0x39e   :  { %v2156_v1 = vpop.f32.mrf.mxu1  ;;  %v4113_v7 = vld [vmem:[#allocation14 + $0x1d4] ss:$28 sps:$4 sm:$0xff]  }
 0x39f   :  { %v4107_v1 = vld [vmem:[#allocation14 + $0x244] ss:$28 sps:$4 sm:$0xff]  }
 0x3a0   :  { %v2157_v4 = vpop.f32.mrf.mxu1 }
 0x3a1   :  { %v4105_v4 = vld [vmem:[#allocation14 + $0x240] ss:$28 sps:$4 sm:$0xff]  }
 0x3da   :  { %v2193_v9 = vpop.f32.mrf.mxu0 }
 0x3db   :  { %v2194_v11 = vadd.f32 %v2193_v9, %v2153_v8  ;;  %v4111_v8 = vld [vmem:[#allocation14 + $0x1d0] ss:$28 sps:$4 sm:$0xff]  }
 0x3dc   :  { %v2195_v12 = vpop.f32.mrf.mxu0  ;;  %v2334_v9 = vld [vmem:[%s4495_s10] sm:$0xff]  ;;  %s4335_s10 = smov [#allocation16]  }
 0x3dd   :  { %v2200_v13 = vmul.f32 0.01, %v2194_v11  ;;  %v2196_v16 = vadd.f32 %v2195_v12, %v2155_v10  ;;  %v2339_v10 = vrot.slane %v2334_v9, %v4429_v15  ;;  %v2343_v12 = vrot.slane %v2334_v9, %v4435_v17  ;;  %s3130_s22 = sshll.u32 %s4335_s10, 4  ;;  %s3131_s22 = int_to_ptr.vmem [resolvable:$true] %s3130_s22 }
 0x3de   :  { %v2197_v18 = vpop.f32.mrf.mxu0  ;;  %s4288_s5 = scalar_lea.vmem %s3131_s22, 896  ;;  %p4293_p13 = scmp.lt.s32.totalorder %s3131_s22, %s3131_s22 }
 0x3df   :  { %v2201_v19 = vmul.f32 0.01, %v2196_v16  ;;  %v2202_v20 = vmax.f32 %v2194_v11, %v2200_v13  ;;  %v2347_v11 = vrot.slane %v2334_v9, %v4440_v35  ;;  %v2351_v13 = vrot.slane %v2334_v9, %v4446_v37  ;;  %p4289_p12 = scmp.ne.s32.totalorder %s3131_s22, %s4288_s5  ;;  %p4294_p0 = scmp.lt.s32.totalorder %s4288_s5, %s4288_s5 }
 0x3e0   :  { %v2198_v21 = vpop.f32.mrf.mxu0 }
 0x3e1   :  { %v2203_v2 = vmax.f32 %v2196_v16, %v2201_v19  ;;  %v4466_v24 = vpack.c.bf16 %v2202_v20, %v2202_v20  ;;  %p4295_p1 = por %p4294_p0, %p4293_p13 }
 0x3e3   :  { %v2205_v3 = vpack.c.bf16 %v2203_v2, %v2203_v2  ;;  %p4296_p2 = pnand %p4295_p1, %p4289_p12 }
 0x3e5   :  { %2979 = vmatprep.mubr.bf16.mxu1 %v2205_v3  ;;  %3020 = vmatprep.mubr.bf16.mxu0 %v2205_v3 }
 0x3e6   :  { %2980 = vmatmul.mubr.bf16.vlgmr.msra.gmra.mxu1 %v4466_v24  ;;  %3021 = vmatmul.mubr.bf16.vlgmr.msra.gmra.mxu0 %v4466_v24 }
 0x3e7   :  { %3030 = vmatpush1.bf16.msra.mxu1 %v4050_v22  ;;  %3521 = vmatpush3.bf16.msra.mxu0 %v4054_v23 }
 0x3e8   :  { %3061 = vmatprep.mubr.bf16.mxu1 %v2205_v3  ;;  %3102 = vmatprep.mubr.bf16.mxu0 %v2205_v3 }
 0x3e9   :  { %3031 = vmatprep.subr.bf16.mxu1 %v4057_v25  ;;  %3522 = vmatprep.subr.bf16.mxu0 %v4058_v26 }
 0x3eb   :  { %3032 = vmatpush1.bf16.msra.mxu1 %v4055_v27  ;;  %3523 = vmatpush3.bf16.msra.mxu0 %v4059_v28  ;;  %v2362_v27 = vsub.s32 6, %v4426_v14 }
 0x3ec   :  { %3033 = vmatprep.subr.bf16.mxu1 %v4062_v29  ;;  %3524 = vmatprep.subr.bf16.mxu0 %v4063_v30 }
 0x3ed   :  { %v2363_v29 = vrot.slane %v2334_v9, %v2362_v27 }
 0x3ef   :  { %3034 = vmatpush1.bf16.msra.mxu1 %v4060_v31  ;;  %3525 = vmatpush3.bf16.msra.mxu0 %v4064_v32 }
 0x3f0   :  { %3035 = vmatprep.subr.bf16.mxu1 %v4067_v33  ;;  %3526 = vmatprep.subr.bf16.mxu0 %v4068_v34 }
 0x3f3   :  { %3036 = vmatpush1.bf16.msra.mxu1 %v4065_v36  ;;  %3527 = vmatpush3.bf16.msra.mxu0 %v4069_v38  ;;  %v2354_v38 = vsub.s32 4, %v4426_v14 }
 0x3f4   :  { %3037 = vmatprep.subr.bf16.mxu1 %v4072_v39  ;;  %3528 = vmatprep.subr.bf16.mxu0 %v4073_v40  ;;  %v2358_v39 = vsub.s32 5, %v4426_v14 }
 0x3f5   :  { %v2355_v40 = vrot.slane %v2334_v9, %v2354_v38 }
 0x3f7   :  { %3038 = vmatpush1.bf16.msra.mxu1 %v4070_v41  ;;  %3529 = vmatpush3.bf16.msra.mxu0 %v4074_v42  ;;  %v2359_v41 = vrot.slane %v2334_v9, %v2358_v39 }
 0x3f8   :  { %3039 = vmatprep.subr.bf16.mxu1 %v4077_v43  ;;  %3530 = vmatprep.subr.bf16.mxu0 %v4078_v44 }
 0x3fb   :  { %3040 = vmatpush1.bf16.msra.mxu1 %v4075_v45  ;;  %3531 = vmatpush3.bf16.msra.mxu0 %v4079_v46 }
 0x3fc   :  { %3041 = vmatprep.subr.bf16.mxu1 %v4082_v47  ;;  %3532 = vmatprep.subr.bf16.mxu0 %v4083_v48 }
 0x3ff   :  { %3042 = vmatpush1.bf16.msra.mxu1 %v4080_v49  ;;  %3533 = vmatpush3.bf16.msra.mxu0 %v4084_v50 }
 0x400   :  { %3043 = vmatprep.subr.bf16.mxu1 %v4087_v51  ;;  %3534 = vmatprep.subr.bf16.mxu0 %v4088_v52 }
 0x403   :  { %3044 = vmatpush1.bf16.msra.mxu1 %v4085_v53  ;;  %3535 = vmatpush3.bf16.msra.mxu0 %v4089_v54 }
 0x404   :  { %3045 = vmatprep.subr.bf16.mxu1 %v4092_v55 }
 0x406   :  { %3103 = vmatmul.mubr.bf16.vlgmr.msra.gmra.mxu0 %v4466_v24 }
 0x407   :  { %3046 = vmatpush2.bf16.msra.mxu1 %v4090_v56 }
 0x408   :  { %3047 = vmatprep.subr.bf16.mxu1 %v4095_v57 }
 0x40b   :  { %3048 = vmatpush2.bf16.msra.mxu1 %v4093_v58 }
 0x40c   :  { %3049 = vmatprep.subr.bf16.mxu1 %v4098_v59 }
 0x40f   :  { %3050 = vmatpush2.bf16.msra.mxu1 %v4096_v60 }
 0x410   :  { %3051 = vmatprep.subr.bf16.mxu1 %v4101_v61 }
 0x413   :  { %3052 = vmatpush2.bf16.msra.mxu1 %v4099_v62 }
 0x414   :  { %3053 = vmatprep.subr.bf16.mxu1 %v4104_v63 }
 0x417   :  { %3054 = vmatpush2.bf16.msra.mxu1 %v4102_v0 }
 0x418   :  { %3055 = vmatprep.subr.bf16.mxu1 %v4107_v1 }
 0x41b   :  { %3056 = vmatpush2.bf16.msra.mxu1 %v4105_v4 }
 0x41c   :  { %3057 = vmatprep.subr.bf16.mxu1 %v4110_v5 }
 0x41f   :  { %3058 = vmatpush2.bf16.msra.mxu1 %v4108_v6 }
 0x420   :  { %3059 = vmatprep.subr.bf16.mxu1 %v4113_v7 }
 0x423   :  { %3060 = vmatpush2.bf16.msra.mxu1 %v4111_v8 }
 0x426   :  { %3062 = vmatmul.mubr.bf16.vlgmr.msra.gmra.mxu1 %v4466_v24 }
 0x4a6   :  { %v2981_v16 = vpop.f32.mrf.mxu1  ;;  %v3022_v18 = vpop.f32.mrf.mxu0 }
 0x4a7   :  { %v2982_v19 = vadd.f32 %v2981_v16, %v2339_v10  ;;  %v3023_v20 = vadd.f32 %v3022_v18, %v2347_v11 }
 0x4a8   :  { %v2983_v21 = vpop.f32.mrf.mxu1  ;;  %v3024_v2 = vpop.f32.mrf.mxu0 }
 0x4a9   :  { %4114 = vtanh.f32 %v2982_v19  ;;  %v2984_v3 = vadd.f32 %v2983_v21, %v2343_v12  ;;  %v3025_v22 = vadd.f32 %v3024_v2, %v2351_v13 }
 0x4aa   :  { %4116 = vtanh.f32 %v3023_v20  ;;  %v2985_v23 = vpop.f32.mrf.mxu1  ;;  %v3026_v24 = vpop.f32.mrf.mxu0 }
 0x4ab   :  { %4118 = vtanh.f32 %v2984_v3 }
 0x4ac   :  { %4120 = vtanh.f32 %v3025_v22  ;;  %v2986_v15 = vpop.f32.mrf.mxu1  ;;  %v3027_v35 = vpop.f32.mrf.mxu0 }
 0x4b6   :  { %v4115_v25 = vpop.eup %4114 }
 0x4b7   :  { %v4117_v17 = vpop.eup %4116  ;;  %3117 = vst [vmem:[#allocation16] sm:$0xff] %v4115_v25 }
 0x4b8   :  { %v4119_v37 = vpop.eup %4118  ;;  %3119 = vst [vmem:[#allocation16 + $0x10] sm:$0xff] %v4117_v17 }
 0x4b9   :  { %v4121_v26 = vpop.eup %4120  ;;  %3118 = vst [vmem:[#allocation16 + $0x8] sm:$0xff] %v4119_v37 }
 0x4ba   :  { %3120 = vst [vmem:[#allocation16 + $0x18] sm:$0xff] %v4121_v26 }
 0x4c6   :  { %v3536_v28 = vpop.f32.mrf.mxu0 }
 0x4c8   :  { %v3537_v30 = vpop.f32.mrf.mxu0 }
 0x4c9   :  { %v3538_v31 = vadd.f32 %v3537_v30, %v3536_v28 }
 0x4ca   :  { %v3539_v32 = vpop.f32.mrf.mxu0 }
 0x4cb   :  { %v3105_v33 = vadd.f32 %v3538_v31, %v2363_v29 }
 0x4cc   :  { %v3540_v34 = vpop.f32.mrf.mxu0 }
 0x4cd   :  { %4122 = vtanh.f32 %v3105_v33 }
 0x4da   :  { %v4123_v36 = vpop.eup %4122 }
 0x4db   :  { %3123 = vst [vmem:[#allocation16 + $0x30] sm:$0xff] %v4123_v36 }
 0x4e6   :  { %v3063_v42 = vpop.f32.mrf.mxu1 }
 0x4e7   :  { %v3064_v43 = vadd.f32 %v3063_v42, %v2355_v40 }
 0x4e8   :  { %v3065_v44 = vpop.f32.mrf.mxu1 }
 0x4e9   :  { %4124 = vtanh.f32 %v3064_v43  ;;  %v3066_v45 = vadd.f32 %v3065_v44, %v2359_v41 }
 0x4ea   :  { %v3067_v46 = vpop.f32.mrf.mxu1 }
 0x4eb   :  { %4126 = vtanh.f32 %v3066_v45 }
 0x4ec   :  { %v3068_v47 = vpop.f32.mrf.mxu1 }
 0x4f6   :  { %v4125_v48 = vpop.eup %4124 }
 0x4f7   :  { %3121 = vst [vmem:[#allocation16 + $0x20] sm:$0xff] %v4125_v48 }
 0x4f8   :  { %v4127_v49 = vpop.eup %4126 }
 0x4f9   :  { %3122 = vst [vmem:[#allocation16 + $0x28] sm:$0xff] %v4127_v49 }
 0x4fa   :  { %4299 = shalt.err (!%p4296_p2)
}
 0x4fb   :  { %3133 = dma.vmem_to_hbm [thread:$0]  %s3131_s22, 896, %s4496_s11, [#allocation4]  }
 0x4fc   :  { %4318 = dma.done.wait [#allocation4], 896  }
 0x4fd   :  { %4319 = vsyncadd [#allocation4], 4294966400 }
 0x4fe   :  { %3137 = vsyncpa [#allocation3], 1 }
 0x4ff   :  { %3138 = vsyncpa [#allocation6], 1 }
 0x500   :  { %3139 = vsyncpa [#allocation9], 1 }
 0x501   :  { %3140 = vsyncpa [#allocation12], 1 }
 0x502   :  { %3141 = vsyncpa [#allocation15], 1 }
 0x503   :  { %3142 = vsyncpa [#allocation4], 1 }

</bundles_post_ra>
